<compile_context>
chip_gen: v7x
topology: tpu7x:2x2x1
jax: 0.10.0
libtpu: 0.0.40
codegen_flags: <defaults>
</compile_context>

<pallas_src>
import functools

import jax
import jax.numpy as jnp
from jax.experimental import pallas as pl
from jax.experimental.pallas import tpu as pltpu


# ----------------------------- Pallas kernel --------------------------------
def _rgcn_encoder_kernel(
    h_ref,        # (N, Dp)      bf16  node embeddings (gathered in wrapper, D zero-padded)
    wcat_ref,     # (Dp, R*Cp)   bf16  relation weights, concatenated along lanes
    wroot_ref,    # (Dp, Cp)     bf16  root/self weight
    bias_ref,     # (1, Cp)      f32   bias
    adjcat_ref,   # (N, R*N)     bf16  lane-stacked, mean-normalized adjacency
    pool_ref,     # (Bp, N)      f32   graph mean-pooling matrix (scatter_mean), row-padded
    out_ref,      # (Bp, Cp)     f32   pooled graph embeddings (padded B, C)
    hw_stack_ref,  # (R*N, Cp)   bf16  VMEM scratch: relation-stacked H @ W_r
    *,
    num_relations,
    n_nodes,
    c_pad,
):
    h = h_ref[...]                                                   # (N, Dp) bf16

    # Root/self term + bias (f32 accumulation on the MXU).
    acc = jnp.dot(h, wroot_ref[...], preferred_element_type=jnp.float32)
    acc = acc + bias_ref[...]                                        # (N, Cp) f32

    # One lane-dense feature transform for ALL relations:
    #   hw[:, r*Cp + c] = (H @ W_r)[:, c]
    hw = jnp.dot(h, wcat_ref[...], preferred_element_type=jnp.float32)   # (N, R*Cp) f32

    # Restack per-relation slices along sublanes into (R*N, Cp). Each copy is a
    # lane-aligned (N, Cp) tile move; the bf16 downcast is fused into the copy
    # (no separate whole-tensor cast pass).
    for r in range(num_relations):
        hw_stack_ref[r * n_nodes:(r + 1) * n_nodes, :] = (
            hw[:, r * c_pad:(r + 1) * c_pad].astype(jnp.bfloat16))

    # Single K = R*N matmul replaces the 16 tiny K=N per-relation dots:
    #   acc[i, c] += sum_{r, j} A_r[i, j] * (H W_r)[j, c]
    acc = acc + jnp.dot(adjcat_ref[...], hw_stack_ref[...],
                        preferred_element_type=jnp.float32)          # (N, Cp) f32

    # scatter_mean over graphs == P @ node_features (exact f32 pooling weights).
    out_ref[...] = jnp.dot(pool_ref[...], acc, preferred_element_type=jnp.float32)


# ----------------------- hoisted parameter preparation ----------------------
def prepare_graph_encoder_params(emb_w, w_rel, w_root, bias, *, d_pad=192, c_pad=128):
    """One-time (per-model) padding / layout / cast of the GraphEncoder parameters."""
    V, D = emb_w.shape
    R, _, C = w_rel.shape
    Dp, Cp = d_pad, c_pad
    assert Dp >= D and Cp >= C

    # Pre-padded, pre-cast embedding table: per-call path is just emb[node_idx].
    emb_pad = jnp.zeros((V, Dp), jnp.float32).at[:, :D].set(emb_w).astype(jnp.bfloat16)

    # W_cat[d, r*Cp + c] = W_r[d, c]  (zero-padded, bf16, lane-concatenated).
    w_rel_p = jnp.zeros((R, Dp, Cp), jnp.float32).at[:, :D, :C].set(w_rel)
    w_cat = jnp.transpose(w_rel_p, (1, 0, 2)).reshape(Dp, R * Cp).astype(jnp.bfloat16)

    w_root_p = jnp.zeros((Dp, Cp), jnp.float32).at[:D, :C].set(w_root).astype(jnp.bfloat16)
    bias_p = jnp.zeros((1, Cp), jnp.float32).at[:, :C].set(bias)

    return dict(emb=emb_pad, wcat=w_cat, wroot=w_root_p, bias=bias_p,
                D=D, C=C, R=R, Dp=Dp, Cp=Cp)


# --------------------------- per-batch graph tensors -------------------------
def build_dense_graph_tensors(edge_index, edge_type, batch_vec,
                              num_relations, num_graphs, num_nodes, *, b_pad=8):
    """Sparse graph structure -> lane-stacked normalized adjacency + row-padded
    mean-pool matrix (kernel-ready layouts, no transpose needed)."""
    N, R = num_nodes, num_relations
    src, dst = edge_index[0], edge_index[1]

    # A_cat[i, r*N + j] = number of edges j->i with relation r (lane-stacked).
    a_cat = jnp.zeros((N, R * N), jnp.float32).at[dst, edge_type * N + src].add(1.0)
    deg = a_cat.reshape(N, R, N).sum(axis=2, keepdims=True)          # per-(node, relation) in-degree
    adj_cat = (a_cat.reshape(N, R, N) / jnp.maximum(deg, 1.0)).reshape(N, R * N)
    adj_cat = adj_cat.astype(jnp.bfloat16)                           # mean aggregation, bf16 operand

    Bp = max(b_pad, num_graphs)
    graph_onehot = jax.nn.one_hot(batch_vec, num_graphs, dtype=jnp.float32)   # (N, B)
    counts = graph_onehot.sum(axis=0)                                # (B,)
    pool = graph_onehot.T / jnp.maximum(counts, 1.0)[:, None]        # (B, N)
    pool_pad = jnp.zeros((Bp, N), jnp.float32).at[:num_graphs, :].set(pool)
    return adj_cat, pool_pad


# ------------------------------ forward wrapper ------------------------------
def graph_encoder_pallas(node_idx, params, adj_cat, pool_pad, num_graphs):
    """Full GraphEncoder forward using pre-prepared params and kernel-ready graph tensors."""
    N = node_idx.shape[0]
    R, D, C, Dp, Cp = params["R"], params["D"], params["C"], params["Dp"], params["Cp"]
    Bp = pool_pad.shape[0]
    assert adj_cat.shape == (N, R * N)

    # Embedding lookup: gather from the pre-padded/pre-cast table (no pad/cast per call).
    h_b = params["emb"][node_idx]                                    # (N, Dp) bf16

    kernel = functools.partial(_rgcn_encoder_kernel,
                               num_relations=R, n_nodes=N, c_pad=Cp)

    grid_spec = pltpu.PrefetchScalarGridSpec(
        num_scalar_prefetch=0,
        grid=(1,),                                   # single step: no pipeline overhead
        in_specs=[
            pl.BlockSpec((N, Dp), lambda i: (0, 0)),
            pl.BlockSpec((Dp, R * Cp), lambda i: (0, 0)),
            pl.BlockSpec((Dp, Cp), lambda i: (0, 0)),
            pl.BlockSpec((1, Cp), lambda i: (0, 0)),
            pl.BlockSpec((N, R * N), lambda i: (0, 0)),
            pl.BlockSpec((Bp, N), lambda i: (0, 0)),
        ],
        out_specs=pl.BlockSpec((Bp, Cp), lambda i: (0, 0)),
        scratch_shapes=[pltpu.VMEM((R * N, Cp), jnp.bfloat16)],
    )

    out_p = pl.pallas_call(
        kernel,
        out_shape=jax.ShapeDtypeStruct((Bp, Cp), jnp.float32),
        grid_spec=grid_spec,
        compiler_params=pltpu.CompilerParams(
            dimension_semantics=("arbitrary",),
        ),
        # TODO(synk): for batched inference on v7x, add a leading "parallel" grid axis
        # over graph batches so work shards across both TensorCores.
    )(h_b, params["wcat"], params["wroot"], params["bias"], adj_cat, pool_pad)

    return out_p[:num_graphs, :C]                    # drop B / C padding (exact)


# --------------------------- reference (plain JAX) ---------------------------
def reference_forward(node_idx, edge_index, edge_type, batch_vec,
                      emb_w, w_rel, w_root, bias,
                      num_relations, num_graphs, num_nodes):
    N = num_nodes
    src, dst = edge_index[0], edge_index[1]
    A = jnp.zeros((num_relations, N, N), jnp.float32).at[edge_type, dst, src].add(1.0)
    adj = A / jnp.maximum(A.sum(axis=2, keepdims=True), 1.0)         # per-relation mean aggr
    onehot = jax.nn.one_hot(batch_vec, num_graphs, dtype=jnp.float32)
    pool = onehot.T / jnp.maximum(onehot.sum(axis=0), 1.0)[:, None]  # (B, N)

    h = emb_w[node_idx]                                              # (N, D)
    out = h @ w_root + bias                                          # root + bias
    out = out + jnp.einsum("rij,jd,rdc->ic", adj, h, w_rel)          # relation aggregation
    return pool @ out                                                # scatter_mean


# --------------------------------- main --------------------------------------
if __name__ == "__main__":
    # Module hyperparameters (from __init__)
    OBJ_EMB_DIM = 168
    OUT_CHANNELS = 64
    NUM_RELATIONS = 16
    NUM_OBJS = 32
    NUM_EMBEDDINGS = NUM_OBJS + 1  # 33

    # Small synthetic graph batch
    N = 16          # total nodes across the batch
    E = 32          # total edges
    B = 2           # number of graphs

    key = jax.random.PRNGKey(0)
    k_emb, k_rel, k_root, k_bias, k_x, k_src, k_dst, k_et = jax.random.split(key, 8)

    # Deterministic parameter init (synthetic, not a checkpoint load)
    emb_w = jax.random.normal(k_emb, (NUM_EMBEDDINGS, OBJ_EMB_DIM), jnp.float32) * 0.1
    w_rel = jax.random.normal(k_rel, (NUM_RELATIONS, OBJ_EMB_DIM, OUT_CHANNELS), jnp.float32) * 0.05
    w_root = jax.random.normal(k_root, (OBJ_EMB_DIM, OUT_CHANNELS), jnp.float32) * 0.05
    bias = jax.random.normal(k_bias, (1, OUT_CHANNELS), jnp.float32) * 0.01

    # Synthetic "batch" fields (batch.x indices, edge_index, edge_attr, batch vector)
    node_idx = jax.random.randint(k_x, (N,), 0, NUM_EMBEDDINGS)
    edge_src = jax.random.randint(k_src, (E,), 0, N)
    edge_dst = jax.random.randint(k_dst, (E,), 0, N)
    edge_index = jnp.stack([edge_src, edge_dst], axis=0)                  # (2, E)
    edge_type = jax.random.randint(k_et, (E,), 0, NUM_RELATIONS)
    batch_vec = jnp.concatenate([jnp.zeros(N // 2, jnp.int32),
                                 jnp.ones(N - N // 2, jnp.int32)])

    # One-time parameter prep (hoisted out of the per-call path).
    params = prepare_graph_encoder_params(emb_w, w_rel, w_root, bias,
                                          d_pad=192, c_pad=128)

    # Per-batch graph tensors (kernel-ready layouts).
    adj_cat, pool_pad = build_dense_graph_tensors(
        edge_index, edge_type, batch_vec, NUM_RELATIONS, B, N, b_pad=8)

    out = graph_encoder_pallas(node_idx, params, adj_cat, pool_pad, B)
    out = jax.block_until_ready(out)

    ref = reference_forward(node_idx, edge_index, edge_type, batch_vec,
                            emb_w, w_rel, w_root, bias, NUM_RELATIONS, B, N)
    assert out.shape == (B, OUT_CHANNELS)
    # bf16 matmul operands (incl. bf16-rounded 1/deg adjacency and H@W intermediate)
    # with f32 accumulation -> bf16-appropriate tolerance vs f32 reference.
    assert jnp.allclose(out, ref, rtol=2e-2, atol=2e-2), "mismatch vs JAX reference"

    print("KERNEL_OK")
</pallas_src>

<mosaic_0001>
module attributes {stable_mosaic.version = 11 : i64} {
  func.func @_rgcn_encoder_kernel(%arg0: i32, %arg1: memref<16x192xbf16, #tpu.memory_space<vmem>>, %arg2: memref<192x2048xbf16, #tpu.memory_space<vmem>>, %arg3: memref<192x128xbf16, #tpu.memory_space<vmem>>, %arg4: memref<1x128xf32, #tpu.memory_space<vmem>>, %arg5: memref<16x256xbf16, #tpu.memory_space<vmem>>, %arg6: memref<8x16xf32, #tpu.memory_space<vmem>>, %arg7: memref<8x128xf32, #tpu.memory_space<vmem>>, %arg8: memref<256x128xbf16, #tpu.memory_space<vmem>>) attributes {dimension_semantics = [#tpu.dimension_semantics<arbitrary>], iteration_bounds = array<i64: 1>, scalar_prefetch = 0 : i64, scratch_operands = 1 : i64, tpu.core_type = #tpu.core_type<tc>, window_params = [{pipeline_mode = #tpu.pipeline_mode<synchronous>, transform_indices = @transform_0, window_bounds = array<i64: 16, 192>}, {pipeline_mode = #tpu.pipeline_mode<synchronous>, transform_indices = @transform_1, window_bounds = array<i64: 192, 2048>}, {pipeline_mode = #tpu.pipeline_mode<synchronous>, transform_indices = @transform_2, window_bounds = array<i64: 192, 128>}, {pipeline_mode = #tpu.pipeline_mode<synchronous>, transform_indices = @transform_3, window_bounds = array<i64: 1, 128>}, {pipeline_mode = #tpu.pipeline_mode<synchronous>, transform_indices = @transform_4, window_bounds = array<i64: 16, 256>}, {pipeline_mode = #tpu.pipeline_mode<synchronous>, transform_indices = @transform_5, window_bounds = array<i64: 8, 16>}, {pipeline_mode = #tpu.pipeline_mode<synchronous>, transform_indices = @transform_6, window_bounds = array<i64: 8, 128>}]} {
    %c0 = arith.constant 0 : index
    %c0_0 = arith.constant 0 : index
    %0 = vector.load %arg1[%c0, %c0_0] : memref<16x192xbf16, #tpu.memory_space<vmem>>, vector<16x192xbf16>
    %c0_1 = arith.constant 0 : index
    %c0_2 = arith.constant 0 : index
    %1 = vector.load %arg3[%c0_1, %c0_2] : memref<192x128xbf16, #tpu.memory_space<vmem>>, vector<192x128xbf16>
    %cst = arith.constant dense<0.000000e+00> : vector<16x128xf32>
    %2 = tpu.matmul %0, %1, %cst {dimension_numbers = #tpu.dot_dimension_numbers<[1], [0], [0], [1], [0, 0, 1, 1], [], []>} : vector<16x192xbf16>, vector<192x128xbf16>, vector<16x128xf32> -> vector<16x128xf32>
    %c0_3 = arith.constant 0 : index
    %c0_4 = arith.constant 0 : index
    %3 = vector.load %arg4[%c0_3, %c0_4] : memref<1x128xf32, #tpu.memory_space<vmem>>, vector<1x128xf32>
    %4 = vector.broadcast %3 : vector<1x128xf32> to vector<16x128xf32>
    %5 = arith.addf %2, %4 : vector<16x128xf32>
    %c0_5 = arith.constant 0 : index
    %c0_6 = arith.constant 0 : index
    %6 = vector.load %arg2[%c0_5, %c0_6] : memref<192x2048xbf16, #tpu.memory_space<vmem>>, vector<192x2048xbf16>
    %cst_7 = arith.constant dense<0.000000e+00> : vector<16x2048xf32>
    %7 = tpu.matmul %0, %6, %cst_7 {dimension_numbers = #tpu.dot_dimension_numbers<[1], [0], [0], [1], [0, 0, 1, 1], [], []>} : vector<16x192xbf16>, vector<192x2048xbf16>, vector<16x2048xf32> -> vector<16x2048xf32>
    %8 = vector.extract_strided_slice %7 {offsets = [0, 0], sizes = [16, 128], strides = [1, 1]} : vector<16x2048xf32> to vector<16x128xf32>
    %9 = arith.truncf %8 : vector<16x128xf32> to vector<16x128xbf16>
    %c0_8 = arith.constant 0 : index
    %c0_9 = arith.constant 0 : index
    %10 = vector.load %arg8[%c0_8, %c0_9] : memref<256x128xbf16, #tpu.memory_space<vmem>>, vector<16x128xbf16>
    tpu.vector_store %arg8[%c0_8, %c0_9], %9 {strides = array<i32>} : memref<256x128xbf16, #tpu.memory_space<vmem>>, vector<16x128xbf16>,
    %11 = vector.extract_strided_slice %7 {offsets = [0, 128], sizes = [16, 128], strides = [1, 1]} : vector<16x2048xf32> to vector<16x128xf32>
    %12 = arith.truncf %11 : vector<16x128xf32> to vector<16x128xbf16>
    %c16 = arith.constant 16 : index
    %c0_10 = arith.constant 0 : index
    %13 = vector.load %arg8[%c16, %c0_10] : memref<256x128xbf16, #tpu.memory_space<vmem>>, vector<16x128xbf16>
    tpu.vector_store %arg8[%c16, %c0_10], %12 {strides = array<i32>} : memref<256x128xbf16, #tpu.memory_space<vmem>>, vector<16x128xbf16>,
    %14 = vector.extract_strided_slice %7 {offsets = [0, 256], sizes = [16, 128], strides = [1, 1]} : vector<16x2048xf32> to vector<16x128xf32>
    %15 = arith.truncf %14 : vector<16x128xf32> to vector<16x128xbf16>
    %c32 = arith.constant 32 : index
    %c0_11 = arith.constant 0 : index
    %16 = vector.load %arg8[%c32, %c0_11] : memref<256x128xbf16, #tpu.memory_space<vmem>>, vector<16x128xbf16>
    tpu.vector_store %arg8[%c32, %c0_11], %15 {strides = array<i32>} : memref<256x128xbf16, #tpu.memory_space<vmem>>, vector<16x128xbf16>,
    %17 = vector.extract_strided_slice %7 {offsets = [0, 384], sizes = [16, 128], strides = [1, 1]} : vector<16x2048xf32> to vector<16x128xf32>
    %18 = arith.truncf %17 : vector<16x128xf32> to vector<16x128xbf16>
    %c48 = arith.constant 48 : index
    %c0_12 = arith.constant 0 : index
    %19 = vector.load %arg8[%c48, %c0_12] : memref<256x128xbf16, #tpu.memory_space<vmem>>, vector<16x128xbf16>
    tpu.vector_store %arg8[%c48, %c0_12], %18 {strides = array<i32>} : memref<256x128xbf16, #tpu.memory_space<vmem>>, vector<16x128xbf16>,
    %20 = vector.extract_strided_slice %7 {offsets = [0, 512], sizes = [16, 128], strides = [1, 1]} : vector<16x2048xf32> to vector<16x128xf32>
    %21 = arith.truncf %20 : vector<16x128xf32> to vector<16x128xbf16>
    %c64 = arith.constant 64 : index
    %c0_13 = arith.constant 0 : index
    %22 = vector.load %arg8[%c64, %c0_13] : memref<256x128xbf16, #tpu.memory_space<vmem>>, vector<16x128xbf16>
    tpu.vector_store %arg8[%c64, %c0_13], %21 {strides = array<i32>} : memref<256x128xbf16, #tpu.memory_space<vmem>>, vector<16x128xbf16>,
    %23 = vector.extract_strided_slice %7 {offsets = [0, 640], sizes = [16, 128], strides = [1, 1]} : vector<16x2048xf32> to vector<16x128xf32>
    %24 = arith.truncf %23 : vector<16x128xf32> to vector<16x128xbf16>
    %c80 = arith.constant 80 : index
    %c0_14 = arith.constant 0 : index
    %25 = vector.load %arg8[%c80, %c0_14] : memref<256x128xbf16, #tpu.memory_space<vmem>>, vector<16x128xbf16>
    tpu.vector_store %arg8[%c80, %c0_14], %24 {strides = array<i32>} : memref<256x128xbf16, #tpu.memory_space<vmem>>, vector<16x128xbf16>,
    %26 = vector.extract_strided_slice %7 {offsets = [0, 768], sizes = [16, 128], strides = [1, 1]} : vector<16x2048xf32> to vector<16x128xf32>
    %27 = arith.truncf %26 : vector<16x128xf32> to vector<16x128xbf16>
    %c96 = arith.constant 96 : index
    %c0_15 = arith.constant 0 : index
    %28 = vector.load %arg8[%c96, %c0_15] : memref<256x128xbf16, #tpu.memory_space<vmem>>, vector<16x128xbf16>
    tpu.vector_store %arg8[%c96, %c0_15], %27 {strides = array<i32>} : memref<256x128xbf16, #tpu.memory_space<vmem>>, vector<16x128xbf16>,
    %29 = vector.extract_strided_slice %7 {offsets = [0, 896], sizes = [16, 128], strides = [1, 1]} : vector<16x2048xf32> to vector<16x128xf32>
    %30 = arith.truncf %29 : vector<16x128xf32> to vector<16x128xbf16>
    %c112 = arith.constant 112 : index
    %c0_16 = arith.constant 0 : index
    %31 = vector.load %arg8[%c112, %c0_16] : memref<256x128xbf16, #tpu.memory_space<vmem>>, vector<16x128xbf16>
    tpu.vector_store %arg8[%c112, %c0_16], %30 {strides = array<i32>} : memref<256x128xbf16, #tpu.memory_space<vmem>>, vector<16x128xbf16>,
    %32 = vector.extract_strided_slice %7 {offsets = [0, 1024], sizes = [16, 128], strides = [1, 1]} : vector<16x2048xf32> to vector<16x128xf32>
    %33 = arith.truncf %32 : vector<16x128xf32> to vector<16x128xbf16>
    %c128 = arith.constant 128 : index
    %c0_17 = arith.constant 0 : index
    %34 = vector.load %arg8[%c128, %c0_17] : memref<256x128xbf16, #tpu.memory_space<vmem>>, vector<16x128xbf16>
    tpu.vector_store %arg8[%c128, %c0_17], %33 {strides = array<i32>} : memref<256x128xbf16, #tpu.memory_space<vmem>>, vector<16x128xbf16>,
    %35 = vector.extract_strided_slice %7 {offsets = [0, 1152], sizes = [16, 128], strides = [1, 1]} : vector<16x2048xf32> to vector<16x128xf32>
    %36 = arith.truncf %35 : vector<16x128xf32> to vector<16x128xbf16>
    %c144 = arith.constant 144 : index
    %c0_18 = arith.constant 0 : index
    %37 = vector.load %arg8[%c144, %c0_18] : memref<256x128xbf16, #tpu.memory_space<vmem>>, vector<16x128xbf16>
    tpu.vector_store %arg8[%c144, %c0_18], %36 {strides = array<i32>} : memref<256x128xbf16, #tpu.memory_space<vmem>>, vector<16x128xbf16>,
    %38 = vector.extract_strided_slice %7 {offsets = [0, 1280], sizes = [16, 128], strides = [1, 1]} : vector<16x2048xf32> to vector<16x128xf32>
    %39 = arith.truncf %38 : vector<16x128xf32> to vector<16x128xbf16>
    %c160 = arith.constant 160 : index
    %c0_19 = arith.constant 0 : index
    %40 = vector.load %arg8[%c160, %c0_19] : memref<256x128xbf16, #tpu.memory_space<vmem>>, vector<16x128xbf16>
    tpu.vector_store %arg8[%c160, %c0_19], %39 {strides = array<i32>} : memref<256x128xbf16, #tpu.memory_space<vmem>>, vector<16x128xbf16>,
    %41 = vector.extract_strided_slice %7 {offsets = [0, 1408], sizes = [16, 128], strides = [1, 1]} : vector<16x2048xf32> to vector<16x128xf32>
    %42 = arith.truncf %41 : vector<16x128xf32> to vector<16x128xbf16>
    %c176 = arith.constant 176 : index
    %c0_20 = arith.constant 0 : index
    %43 = vector.load %arg8[%c176, %c0_20] : memref<256x128xbf16, #tpu.memory_space<vmem>>, vector<16x128xbf16>
    tpu.vector_store %arg8[%c176, %c0_20], %42 {strides = array<i32>} : memref<256x128xbf16, #tpu.memory_space<vmem>>, vector<16x128xbf16>,
    %44 = vector.extract_strided_slice %7 {offsets = [0, 1536], sizes = [16, 128], strides = [1, 1]} : vector<16x2048xf32> to vector<16x128xf32>
    %45 = arith.truncf %44 : vector<16x128xf32> to vector<16x128xbf16>
    %c192 = arith.constant 192 : index
    %c0_21 = arith.constant 0 : index
    %46 = vector.load %arg8[%c192, %c0_21] : memref<256x128xbf16, #tpu.memory_space<vmem>>, vector<16x128xbf16>
    tpu.vector_store %arg8[%c192, %c0_21], %45 {strides = array<i32>} : memref<256x128xbf16, #tpu.memory_space<vmem>>, vector<16x128xbf16>,
    %47 = vector.extract_strided_slice %7 {offsets = [0, 1664], sizes = [16, 128], strides = [1, 1]} : vector<16x2048xf32> to vector<16x128xf32>
    %48 = arith.truncf %47 : vector<16x128xf32> to vector<16x128xbf16>
    %c208 = arith.constant 208 : index
    %c0_22 = arith.constant 0 : index
    %49 = vector.load %arg8[%c208, %c0_22] : memref<256x128xbf16, #tpu.memory_space<vmem>>, vector<16x128xbf16>
    tpu.vector_store %arg8[%c208, %c0_22], %48 {strides = array<i32>} : memref<256x128xbf16, #tpu.memory_space<vmem>>, vector<16x128xbf16>,
    %50 = vector.extract_strided_slice %7 {offsets = [0, 1792], sizes = [16, 128], strides = [1, 1]} : vector<16x2048xf32> to vector<16x128xf32>
    %51 = arith.truncf %50 : vector<16x128xf32> to vector<16x128xbf16>
    %c224 = arith.constant 224 : index
    %c0_23 = arith.constant 0 : index
    %52 = vector.load %arg8[%c224, %c0_23] : memref<256x128xbf16, #tpu.memory_space<vmem>>, vector<16x128xbf16>
    tpu.vector_store %arg8[%c224, %c0_23], %51 {strides = array<i32>} : memref<256x128xbf16, #tpu.memory_space<vmem>>, vector<16x128xbf16>,
    %53 = vector.extract_strided_slice %7 {offsets = [0, 1920], sizes = [16, 128], strides = [1, 1]} : vector<16x2048xf32> to vector<16x128xf32>
    %54 = arith.truncf %53 : vector<16x128xf32> to vector<16x128xbf16>
    %c240 = arith.constant 240 : index
    %c0_24 = arith.constant 0 : index
    %55 = vector.load %arg8[%c240, %c0_24] : memref<256x128xbf16, #tpu.memory_space<vmem>>, vector<16x128xbf16>
    tpu.vector_store %arg8[%c240, %c0_24], %54 {strides = array<i32>} : memref<256x128xbf16, #tpu.memory_space<vmem>>, vector<16x128xbf16>,
    %c0_25 = arith.constant 0 : index
    %c0_26 = arith.constant 0 : index
    %56 = vector.load %arg5[%c0_25, %c0_26] : memref<16x256xbf16, #tpu.memory_space<vmem>>, vector<16x256xbf16>
    %c0_27 = arith.constant 0 : index
    %c0_28 = arith.constant 0 : index
    %57 = vector.load %arg8[%c0_27, %c0_28] : memref<256x128xbf16, #tpu.memory_space<vmem>>, vector<256x128xbf16>
    %cst_29 = arith.constant dense<0.000000e+00> : vector<16x128xf32>
    %58 = tpu.matmul %56, %57, %cst_29 {dimension_numbers = #tpu.dot_dimension_numbers<[1], [0], [0], [1], [0, 0, 1, 1], [], []>} : vector<16x256xbf16>, vector<256x128xbf16>, vector<16x128xf32> -> vector<16x128xf32>
    %59 = arith.addf %5, %58 : vector<16x128xf32>
    %c0_30 = arith.constant 0 : index
    %c0_31 = arith.constant 0 : index
    %60 = vector.load %arg6[%c0_30, %c0_31] : memref<8x16xf32, #tpu.memory_space<vmem>>, vector<8x16xf32>
    %cst_32 = arith.constant dense<0.000000e+00> : vector<8x128xf32>
    %61 = tpu.matmul %60, %59, %cst_32 {dimension_numbers = #tpu.dot_dimension_numbers<[1], [0], [0], [1], [0, 0, 1, 1], [], []>} : vector<8x16xf32>, vector<16x128xf32>, vector<8x128xf32> -> vector<8x128xf32>
    %c0_33 = arith.constant 0 : index
    %c0_34 = arith.constant 0 : index
    %62 = vector.load %arg7[%c0_33, %c0_34] : memref<8x128xf32, #tpu.memory_space<vmem>>, vector<8x128xf32>
    tpu.vector_store %arg7[%c0_33, %c0_34], %61 {strides = array<i32>} : memref<8x128xf32, #tpu.memory_space<vmem>>, vector<8x128xf32>,
    return
  }
  func.func @transform_0(%arg0: i32) -> (i32, i32) {
    %c0_i32 = arith.constant 0 : i32
    %c0_i32_0 = arith.constant 0 : i32
    %c0_i32_1 = arith.constant 0 : i32
    return %c0_i32, %c0_i32_0 : i32, i32
  }
  func.func @transform_1(%arg0: i32) -> (i32, i32) {
    %c0_i32 = arith.constant 0 : i32
    %c0_i32_0 = arith.constant 0 : i32
    %c0_i32_1 = arith.constant 0 : i32
    return %c0_i32, %c0_i32_0 : i32, i32
  }
  func.func @transform_2(%arg0: i32) -> (i32, i32) {
    %c0_i32 = arith.constant 0 : i32
    %c0_i32_0 = arith.constant 0 : i32
    %c0_i32_1 = arith.constant 0 : i32
    return %c0_i32, %c0_i32_0 : i32, i32
  }
  func.func @transform_3(%arg0: i32) -> (i32, i32) {
    %c0_i32 = arith.constant 0 : i32
    %c0_i32_0 = arith.constant 0 : i32
    %c0_i32_1 = arith.constant 0 : i32
    return %c0_i32, %c0_i32_0 : i32, i32
  }
  func.func @transform_4(%arg0: i32) -> (i32, i32) {
    %c0_i32 = arith.constant 0 : i32
    %c0_i32_0 = arith.constant 0 : i32
    %c0_i32_1 = arith.constant 0 : i32
    return %c0_i32, %c0_i32_0 : i32, i32
  }
  func.func @transform_5(%arg0: i32) -> (i32, i32) {
    %c0_i32 = arith.constant 0 : i32
    %c0_i32_0 = arith.constant 0 : i32
    %c0_i32_1 = arith.constant 0 : i32
    return %c0_i32, %c0_i32_0 : i32, i32
  }
  func.func @transform_6(%arg0: i32) -> (i32, i32) {
    %c0_i32 = arith.constant 0 : i32
    %c0_i32_0 = arith.constant 0 : i32
    %c0_i32_1 = arith.constant 0 : i32
    return %c0_i32, %c0_i32_0 : i32, i32
  }
}

</mosaic_0001>

<bundles_post_ra>
// kernel: tpu_custom_call.1
= control target key start
LH: loop header
LB: loop body
LE: loop exit
PB: predicated region body
PF: predicated region fallthrough
CT: control target
= control target key end

     0   :  { %11 = vsyncpa [#allocation4], 0  ;;  %s2508_s0 = inlined_call_operand.hbm [shape: bf16[16,192], index: 0, kind: input, shape index: {}]   ;;  %s2509_s1 = inlined_call_operand.hbm [shape: bf16[192,2048], index: 1, kind: input, shape index: {}]   ;;  %s2510_s2 = inlined_call_operand.hbm [shape: bf16[192,128], index: 2, kind: input, shape index: {}]   ;;  %s2511_s3 = inlined_call_operand.vmem [shape: f32[1,128], index: 3, kind: input, shape index: {}]   ;;  %s2512_s4 = inlined_call_operand.hbm [shape: bf16[16,256], index: 4, kind: input, shape index: {}]   ;;  %s2513_s5 = inlined_call_operand.vmem [shape: f32[8,16], index: 5, kind: input, shape index: {}]   ;;  %s2514_s6 = inlined_call_operand.hbm [shape: f32[8,128], index: 6, kind: output, shape index: {}]  }
   0x1   :  { %12 = vsyncpa [#allocation7], 0 }
   0x2   :  { %13 = vsyncpa [#allocation10], 0 }
   0x3   :  { %14 = vsyncpa [#allocation5], 0  ;;  %s2337_s21 = smov [#allocation6]   ;;  %s2219_s25 = scalar_lea.hbm %s2509_s1, 24576 }
   0x4   :  { %s32_s22 = sshll.u32 %s2337_s21, 4  ;;  %p2220_p0 = scmp.ne.s32.totalorder %s2509_s1, %s2219_s25  ;;  %s33_s22 = int_to_ptr.vmem [resolvable:$true] %s32_s22 }
   0x5   :  { %p2223_p1 = scmp.lt.u32.totalorder %s2219_s25, %s2509_s1 }
   0x7   :  { %p2225_p2 = pnand %p2223_p1, %p2220_p0 }
   0x9   :  { %2228 = shalt.err (!%p2225_p2)
}
   0xa   :  { %s2229_s30 = scalar_lea.vmem %s33_s22, 24576  ;;  %p2234_p4 = scmp.lt.s32.totalorder %s33_s22, %s33_s22 }
   0xb   :  { %p2230_p3 = scmp.ne.s32.totalorder %s33_s22, %s2229_s30  ;;  %p2235_p5 = scmp.lt.s32.totalorder %s2229_s30, %s2229_s30 }
   0xd   :  { %p2236_p6 = por %p2235_p5, %p2234_p4 }
   0xf   :  { %p2237_p7 = pnand %p2236_p6, %p2230_p3 }
  0x11   :  { %2240 = shalt.err (!%p2237_p7)
}
  0x12   :  { %s2338_s7 = smov 1024   ;;  %s2339_s8 = smov 64  }
  0x13   :  { %38 = dma.hbm_to_vmem [thread:$0]  %s2509_s1, 24576, %s33_s22, [#allocation7], %s2338_s7, %s2338_s7, %s2339_s8  }
  0x14   :  { %s2340_s11 = smov [#allocation3]   ;;  %s2241_s15 = scalar_lea.hbm %s2508_s0, 256 }
  0x15   :  { %s20_s12 = sshll.u32 %s2340_s11, 4  ;;  %p2242_p8 = scmp.ne.s32.totalorder %s2508_s0, %s2241_s15  ;;  %s21_s12 = int_to_ptr.vmem [resolvable:$true] %s20_s12 }
  0x16   :  { %p2245_p9 = scmp.lt.u32.totalorder %s2241_s15, %s2508_s0 }
  0x18   :  { %p2247_p10 = pnand %p2245_p9, %p2242_p8 }
  0x1a   :  { %2250 = shalt.err (!%p2247_p10)
}
  0x1b   :  { %s2251_s20 = scalar_lea.vmem %s21_s12, 256  ;;  %p2256_p12 = scmp.lt.s32.totalorder %s21_s12, %s21_s12 }
  0x1c   :  { %p2252_p11 = scmp.ne.s32.totalorder %s21_s12, %s2251_s20  ;;  %p2257_p13 = scmp.lt.s32.totalorder %s2251_s20, %s2251_s20 }
  0x1e   :  { %p2258_p0 = por %p2257_p13, %p2256_p12 }
  0x20   :  { %p2259_p1 = pnand %p2258_p0, %p2252_p11 }
  0x22   :  { %2262 = shalt.err (!%p2259_p1)
}
  0x23   :  { %s2341_s1 = smov 128   ;;  %s2342_s21 = smov 8  }
  0x24   :  { %26 = dma.hbm_to_vmem [thread:$0]  %s2508_s0, 256, %s21_s12, [#allocation4], %s2341_s1, %s2341_s1, %s2342_s21  }
  0x25   :  { %s2343_s24 = smov [#allocation8]   ;;  %s2344_s26 = smov [#allocation9]  }
  0x26   :  { %s44_s25 = sshll.u32 %s2343_s24, 4  ;;  %s58_s27 = sshll.u32 %s2344_s26, 4  ;;  %s45_s25 = int_to_ptr.vmem [resolvable:$true] %s44_s25  ;;  %s59_s27 = int_to_ptr.vmem [resolvable:$true] %s58_s27 }
  0x27   :  { %s2263_s30 = scalar_lea.hbm %s2510_s2, 1536 }
  0x28   :  { %p2264_p2 = scmp.ne.s32.totalorder %s2510_s2, %s2263_s30  ;;  %p2267_p3 = scmp.lt.u32.totalorder %s2263_s30, %s2510_s2 }
  0x2a   :  { %p2269_p4 = pnand %p2267_p3, %p2264_p2 }
  0x2c   :  { %2272 = shalt.err (!%p2269_p4)
}
  0x2d   :  { %s2273_s0 = scalar_lea.vmem %s45_s25, 1536  ;;  %p2278_p6 = scmp.lt.s32.totalorder %s45_s25, %s45_s25 }
  0x2e   :  { %p2274_p5 = scmp.ne.s32.totalorder %s45_s25, %s2273_s0  ;;  %p2279_p7 = scmp.lt.s32.totalorder %s2273_s0, %s2273_s0 }
  0x30   :  { %p2280_p8 = por %p2279_p7, %p2278_p6 }
  0x32   :  { %p2281_p9 = pnand %p2280_p8, %p2274_p5 }
  0x34   :  { %2284 = shalt.err (!%p2281_p9)
}
  0x35   :  { %s2345_s12 = smov 4   ;;  %s2285_s17 = scalar_lea.hbm %s2512_s4, 256 }
  0x36   :  { %50 = dma.hbm_to_vmem [thread:$0]  %s2510_s2, 1536, %s45_s25, [#allocation7], %s2339_s8, %s2339_s8, %s2345_s12  }
  0x37   :  { %p2286_p10 = scmp.ne.s32.totalorder %s2512_s4, %s2285_s17  ;;  %p2289_p11 = scmp.lt.u32.totalorder %s2285_s17, %s2512_s4 }
  0x39   :  { %p2291_p12 = pnand %p2289_p11, %p2286_p10 }
  0x3b   :  { %2294 = shalt.err (!%p2291_p12)
}
  0x3c   :  { %s2295_s23 = scalar_lea.vmem %s59_s27, 256  ;;  %p2300_p0 = scmp.lt.s32.totalorder %s59_s27, %s59_s27 }
  0x3d   :  { %p2296_p13 = scmp.ne.s32.totalorder %s59_s27, %s2295_s23  ;;  %p2301_p1 = scmp.lt.s32.totalorder %s2295_s23, %s2295_s23 }
  0x3f   :  { %p2302_p2 = por %p2301_p1, %p2300_p0 }
  0x41   :  { %p2303_p3 = pnand %p2302_p2, %p2296_p13 }
  0x43   :  { %2306 = shalt.err (!%p2303_p3)
}
  0x44   :  { %64 = dma.hbm_to_vmem [thread:$0]  %s2512_s4, 256, %s59_s27, [#allocation10], %s2341_s1, %s2341_s1, %s2342_s21  }
  0x45   :  { %2329 = dma.done.wait [#allocation4], 256  }
  0x46   :  { %2330 = vsyncadd [#allocation4], 4294967040 }
  0x47   :  { %2331 = dma.done.wait [#allocation7], 26112  }
  0x48   :  { %2332 = vsyncadd [#allocation7], 4294941184 }
  0x49   :  { %2333 = dma.done.wait [#allocation10], 256  }
  0x4a   :  { %2334 = vsyncadd [#allocation10], 4294967040  ;;  %v2346_v0 = vmov 0   ;;  %v2199_v1 = vld [vmem:[#allocation8] sm:$0xff]   ;;  %v2200_v6 = vld [vmem:[#allocation8 + $0x8] sm:$0xff]   ;;  %vm194_vm0 = vcmask 523264  }
  0x4b   :  { %198 = vmatprep.subr.bf16.mxu0 %v2346_v0  ;;  %v239_v2 = vld [vmem:[#allocation6] sm:$0xff]  ;;  %v2201_v13 = vld [vmem:[#allocation8 + $0x10] sm:$0xff]   ;;  %v2202_v18 = vld [vmem:[#allocation8 + $0x18] sm:$0xff]   ;;  %vm2348_vm1 = vmmov 0   ;;  %vm1839_vm2 = vcmask 130048  }
  0x4c   :  { %v247_v3 = vld [vmem:[#allocation6 + $0x40] sm:$0xff]  ;;  %199 = vmatpush1.bf16.msra.mxu0 %v2199_v1  ;;  %v2204_v28 = vld [vmem:[#allocation8 + $0x28] sm:$0xff]   ;;  %v2449_v32 = vld [vmem:[#allocation3 + $0x4] ss:$8 sps:$4 sm:$0xff]  }
  0x4d   :  { %v1948_v4 = vcombine.high %v239_v2, %v247_v3  ;;  %v1947_v5 = vcombine.low %v239_v2, %v247_v3  ;;  %v255_v7 = vld [vmem:[#allocation6 + $0x80] sm:$0xff]  ;;  %200 = vmatprep.subr.bf16.mxu0 %v2346_v0  ;;  %v2205_v34 = vld [vmem:[#allocation8 + $0x30] sm:$0xff]   ;;  %1946 = vmatprep.mubr.msk.bf16.mxu0 %vm194_vm0, %v2449_v32  ;;  %v2206_v39 = vld [vmem:[#allocation8 + $0x38] sm:$0xff]  }
  0x4e   :  { %v263_v8 = vld [vmem:[#allocation6 + $0xc0] sm:$0xff]  ;;  %2139 = vmatprep.mubr.msk.bf16.mxu1 %vm194_vm0, %v2449_v32  ;;  %v2208_v49 = vld [vmem:[#allocation8 + $0x48] sm:$0xff]   ;;  %v2209_v54 = vld [vmem:[#allocation8 + $0x50] sm:$0xff]  }
  0x4f   :  { %1391 = vmatprep.subr.bf16.mxu1 %v1948_v4  ;;  %v1964_v9 = vcombine.high %v255_v7, %v263_v8  ;;  %v271_v10 = vld [vmem:[#allocation6 + $0x100] sm:$0xff]  ;;  %v1963_v12 = vcombine.low %v255_v7, %v263_v8  ;;  %v240_v58 = vld [vmem:[#allocation6 + $0x8] sm:$0xff]  ;;  %v2210_v61 = vld [vmem:[#allocation8 + $0x58] sm:$0xff]  }
  0x50   :  { %v279_v11 = vld [vmem:[#allocation6 + $0x140] sm:$0xff]  ;;  %1392 = vmatpush1.bf16.msra.mxu1 %v1947_v5  ;;  %201 = vmatpush1.bf16.msra.mxu0 %v2200_v6  ;;  %v248_v59 = vld [vmem:[#allocation6 + $0x48] sm:$0xff]  ;;  %v241_v1 = vld [vmem:[#allocation6 + $0x10] sm:$0xff] }
  0x51   :  { %1393 = vmatprep.subr.bf16.mxu1 %v1964_v9  ;;  %v1980_v14 = vcombine.high %v271_v10, %v279_v11  ;;  %202 = vmatprep.subr.bf16.mxu0 %v2346_v0  ;;  %v287_v15 = vld [vmem:[#allocation6 + $0x180] sm:$0xff]  ;;  %v1979_v17 = vcombine.low %v271_v10, %v279_v11  ;;  %v1950_v63 = vcombine.high %v240_v58, %v248_v59  ;;  %v249_v2 = vld [vmem:[#allocation6 + $0x50] sm:$0xff]  ;;  %v256_v3 = vld [vmem:[#allocation6 + $0x88] sm:$0xff] }
  0x52   :  { %v295_v16 = vld [vmem:[#allocation6 + $0x1c0] sm:$0xff]  ;;  %v264_v4 = vld [vmem:[#allocation6 + $0xc8] sm:$0xff]  ;;  %v2461_v6 = vld [vmem:[#allocation3] ss:$8 sps:$4 sm:$0xff]   ;;  %v1949_v7 = vcombine.low %v240_v58, %v248_v59  ;;  %v1952_v8 = vcombine.high %v241_v1, %v249_v2 }
  0x53   :  { %v1996_v19 = vcombine.high %v287_v15, %v295_v16  ;;  %v303_v20 = vld [vmem:[#allocation6 + $0x200] sm:$0xff]  ;;  %v1995_v22 = vcombine.low %v287_v15, %v295_v16  ;;  %v1966_v9 = vcombine.high %v256_v3, %v264_v4  ;;  %v257_v10 = vld [vmem:[#allocation6 + $0x90] sm:$0xff] }
  0x54   :  { %1394 = vmatpush1.bf16.msra.mxu1 %v1963_v12  ;;  %203 = vmatpush1.bf16.msra.mxu0 %v2201_v13  ;;  %v311_v21 = vld [vmem:[#allocation6 + $0x240] sm:$0xff]  ;;  %v265_v11 = vld [vmem:[#allocation6 + $0xd0] sm:$0xff]  ;;  %v272_v12 = vld [vmem:[#allocation6 + $0x108] sm:$0xff] }
  0x55   :  { %1395 = vmatprep.subr.bf16.mxu1 %v1980_v14  ;;  %204 = vmatprep.subr.bf16.mxu0 %v2346_v0  ;;  %v2203_v23 = vld [vmem:[#allocation8 + $0x20] sm:$0xff]   ;;  %v2012_v24 = vcombine.high %v303_v20, %v311_v21  ;;  %v2011_v27 = vcombine.low %v303_v20, %v311_v21  ;;  %v280_v13 = vld [vmem:[#allocation6 + $0x148] sm:$0xff]  ;;  %v1965_v14 = vcombine.low %v256_v3, %v264_v4  ;;  %v361_v59 = vld [vmem:[#allocation6 + $0x3d0] sm:$0xff] }
  0x56   :  { %v319_v25 = vld [vmem:[#allocation6 + $0x280] sm:$0xff]  ;;  %v1968_v15 = vcombine.high %v257_v10, %v265_v11  ;;  %v1982_v16 = vcombine.high %v272_v12, %v280_v13  ;;  %v296_v20 = vld [vmem:[#allocation6 + $0x1c8] sm:$0xff]  ;;  %v1967_v21 = vcombine.low %v257_v10, %v265_v11  ;;  %v369_v3 = vld [vmem:[#allocation6 + $0x410] sm:$0xff] }
  0x57   :  { %v327_v26 = vld [vmem:[#allocation6 + $0x2c0] sm:$0xff]  ;;  %v377_v4 = vld [vmem:[#allocation6 + $0x450] sm:$0xff] }
  0x58   :  { %1396 = vmatpush1.bf16.msra.mxu1 %v1979_v17  ;;  %205 = vmatpush1.bf16.msra.mxu0 %v2202_v18  ;;  %v2028_v29 = vcombine.high %v319_v25, %v327_v26  ;;  %v335_v30 = vld [vmem:[#allocation6 + $0x300] sm:$0xff]  ;;  %v2027_v33 = vcombine.low %v319_v25, %v327_v26  ;;  %v273_v17 = vld [vmem:[#allocation6 + $0x110] sm:$0xff]  ;;  %v2080_v10 = vcombine.high %v369_v3, %v377_v4 }
  0x59   :  { %1397 = vmatprep.subr.bf16.mxu1 %v1996_v19  ;;  %206 = vmatprep.subr.bf16.mxu0 %v2346_v0  ;;  %v343_v31 = vld [vmem:[#allocation6 + $0x340] sm:$0xff]  ;;  %v281_v18 = vld [vmem:[#allocation6 + $0x150] sm:$0xff]  ;;  %v288_v19 = vld [vmem:[#allocation6 + $0x188] sm:$0xff] }
  0x5a   :  { %v2044_v35 = vcombine.high %v335_v30, %v343_v31  ;;  %v351_v36 = vld [vmem:[#allocation6 + $0x380] sm:$0xff]  ;;  %v2043_v38 = vcombine.low %v335_v30, %v343_v31  ;;  %v289_v25 = vld [vmem:[#allocation6 + $0x190] sm:$0xff]  ;;  %v1997_v30 = vcombine.low %v288_v19, %v296_v20 }
  0x5b   :  { %v359_v37 = vld [vmem:[#allocation6 + $0x3c0] sm:$0xff]  ;;  %v297_v26 = vld [vmem:[#allocation6 + $0x1d0] sm:$0xff] }
  0x5c   :  { %1398 = vmatpush1.bf16.msra.mxu1 %v1995_v22  ;;  %207 = vmatpush1.bf16.msra.mxu0 %v2203_v23  ;;  %v2060_v40 = vcombine.high %v351_v36, %v359_v37  ;;  %v367_v41 = vld [vmem:[#allocation6 + $0x400] sm:$0xff]  ;;  %v2059_v43 = vcombine.low %v351_v36, %v359_v37  ;;  %v1981_v22 = vcombine.low %v272_v12, %v280_v13  ;;  %v320_v36 = vld [vmem:[#allocation6 + $0x288] sm:$0xff]  ;;  %v385_v12 = vld [vmem:[#allocation6 + $0x490] sm:$0xff] }
  0x5d   :  { %1399 = vmatprep.subr.bf16.mxu1 %v2012_v24  ;;  %208 = vmatprep.subr.bf16.mxu0 %v2346_v0  ;;  %v375_v42 = vld [vmem:[#allocation6 + $0x440] sm:$0xff]  ;;  %v1984_v23 = vcombine.high %v273_v17, %v281_v18  ;;  %v1998_v24 = vcombine.high %v288_v19, %v296_v20  ;;  %v2000_v31 = vcombine.high %v289_v25, %v297_v26  ;;  %v328_v37 = vld [vmem:[#allocation6 + $0x2c8] sm:$0xff]  ;;  %v393_v13 = vld [vmem:[#allocation6 + $0x4d0] sm:$0xff] }
  0x5e   :  { %v2207_v44 = vld [vmem:[#allocation8 + $0x40] sm:$0xff]   ;;  %v2076_v45 = vcombine.high %v367_v41, %v375_v42  ;;  %v2075_v48 = vcombine.low %v367_v41, %v375_v42  ;;  %v2030_v41 = vcombine.high %v320_v36, %v328_v37  ;;  %v321_v42 = vld [vmem:[#allocation6 + $0x290] sm:$0xff] }
  0x5f   :  { %v383_v46 = vld [vmem:[#allocation6 + $0x480] sm:$0xff]  ;;  %v401_v19 = vld [vmem:[#allocation6 + $0x510] sm:$0xff] }
  0x60   :  { %1400 = vmatpush1.bf16.msra.mxu1 %v2011_v27  ;;  %209 = vmatpush1.bf16.msra.mxu0 %v2204_v28  ;;  %v391_v47 = vld [vmem:[#allocation6 + $0x4c0] sm:$0xff]  ;;  %v304_v27 = vld [vmem:[#allocation6 + $0x208] sm:$0xff]  ;;  %v409_v20 = vld [vmem:[#allocation6 + $0x550] sm:$0xff] }
  0x61   :  { %1401 = vmatprep.subr.bf16.mxu1 %v2028_v29  ;;  %210 = vmatprep.subr.bf16.mxu0 %v2346_v0  ;;  %v2092_v50 = vcombine.high %v383_v46, %v391_v47  ;;  %v399_v51 = vld [vmem:[#allocation6 + $0x500] sm:$0xff]  ;;  %v2091_v53 = vcombine.low %v383_v46, %v391_v47  ;;  %v312_v28 = vld [vmem:[#allocation6 + $0x248] sm:$0xff]  ;;  %v1983_v29 = vcombine.low %v273_v17, %v281_v18 }
  0x62   :  { %v407_v52 = vld [vmem:[#allocation6 + $0x540] sm:$0xff]  ;;  %v2029_v47 = vcombine.low %v320_v36, %v328_v37  ;;  %v2096_v17 = vcombine.high %v385_v12, %v393_v13 }
  0x63   :  { %v2108_v55 = vcombine.high %v399_v51, %v407_v52  ;;  %v415_v56 = vld [vmem:[#allocation6 + $0x580] sm:$0xff]  ;;  %v2107_v60 = vcombine.low %v399_v51, %v407_v52  ;;  %v345_v51 = vld [vmem:[#allocation6 + $0x350] sm:$0xff]  ;;  %v352_v52 = vld [vmem:[#allocation6 + $0x388] sm:$0xff] }
  0x64   :  { %1402 = vmatpush1.bf16.msra.mxu1 %v2027_v33  ;;  %211 = vmatpush1.bf16.msra.mxu0 %v2205_v34  ;;  %v423_v57 = vld [vmem:[#allocation6 + $0x5c0] sm:$0xff]  ;;  %v2014_v33 = vcombine.high %v304_v27, %v312_v28  ;;  %v305_v34 = vld [vmem:[#allocation6 + $0x210] sm:$0xff] }
  0x65   :  { %1403 = vmatprep.subr.bf16.mxu1 %v2044_v35  ;;  %212 = vmatprep.subr.bf16.mxu0 %v2346_v0  ;;  %v2124_v62 = vcombine.high %v415_v56, %v423_v57  ;;  %v2123_v5 = vcombine.low %v415_v56, %v423_v57  ;;  %v313_v35 = vld [vmem:[#allocation6 + $0x250] sm:$0xff]  ;;  %v243_v36 = vld [vmem:[#allocation6 + $0x20] sm:$0xff] }
  0x66   :  { %v2015_v46 = vcombine.low %v305_v34, %v313_v35  ;;  %v353_v57 = vld [vmem:[#allocation6 + $0x390] sm:$0xff]  ;;  %v251_v37 = vld [vmem:[#allocation6 + $0x60] sm:$0xff] }
  0x68   :  { %1404 = vmatpush1.bf16.msra.mxu1 %v2043_v38  ;;  %213 = vmatpush1.bf16.msra.mxu0 %v2206_v39  ;;  %v1999_v38 = vcombine.low %v289_v25, %v297_v26  ;;  %v2013_v39 = vcombine.low %v304_v27, %v312_v28  ;;  %v2112_v25 = vcombine.high %v401_v19, %v409_v20  ;;  %v417_v27 = vld [vmem:[#allocation6 + $0x590] sm:$0xff] }
  0x69   :  { %1405 = vmatprep.subr.bf16.mxu1 %v2060_v40  ;;  %214 = vmatprep.subr.bf16.mxu0 %v2346_v0  ;;  %v2016_v40 = vcombine.high %v305_v34, %v313_v35  ;;  %v425_v28 = vld [vmem:[#allocation6 + $0x5d0] sm:$0xff] }
  0x6a   :  { %v2128_v34 = vcombine.high %v417_v27, %v425_v28 }
  0x6c   :  { %1406 = vmatpush1.bf16.msra.mxu1 %v2059_v43  ;;  %215 = vmatpush1.bf16.msra.mxu0 %v2207_v44  ;;  %v329_v43 = vld [vmem:[#allocation6 + $0x2d0] sm:$0xff]  ;;  %v336_v44 = vld [vmem:[#allocation6 + $0x308] sm:$0xff] }
  0x6d   :  { %1407 = vmatprep.subr.bf16.mxu1 %v2076_v45  ;;  %216 = vmatprep.subr.bf16.mxu0 %v2346_v0  ;;  %v344_v45 = vld [vmem:[#allocation6 + $0x348] sm:$0xff] }
  0x70   :  { %1408 = vmatpush1.bf16.msra.mxu1 %v2075_v48  ;;  %217 = vmatpush1.bf16.msra.mxu0 %v2208_v49  ;;  %v2032_v48 = vcombine.high %v321_v42, %v329_v43  ;;  %v2046_v49 = vcombine.high %v336_v44, %v344_v45 }
  0x71   :  { %1409 = vmatprep.subr.bf16.mxu1 %v2092_v50  ;;  %218 = vmatprep.subr.bf16.mxu0 %v2346_v0  ;;  %v337_v50 = vld [vmem:[#allocation6 + $0x310] sm:$0xff] }
  0x72   :  { %v2048_v56 = vcombine.high %v337_v50, %v345_v51 }
  0x74   :  { %1410 = vmatpush1.bf16.msra.mxu1 %v2091_v53  ;;  %219 = vmatpush1.bf16.msra.mxu0 %v2209_v54  ;;  %v360_v53 = vld [vmem:[#allocation6 + $0x3c8] sm:$0xff]  ;;  %v2031_v54 = vcombine.low %v321_v42, %v329_v43  ;;  %v1956_v42 = vcombine.high %v243_v36, %v251_v37 }
  0x75   :  { %1411 = vmatprep.subr.bf16.mxu1 %v2108_v55  ;;  %220 = vmatprep.subr.bf16.mxu0 %v2346_v0  ;;  %v1951_v0 = vcombine.low %v241_v1, %v249_v2  ;;  %v2045_v55 = vcombine.low %v336_v44, %v344_v45  ;;  %v2062_v58 = vcombine.high %v352_v52, %v360_v53  ;;  %v259_v44 = vld [vmem:[#allocation6 + $0xa0] sm:$0xff] }
  0x76   :  { %v2064_v1 = vcombine.high %v353_v57, %v361_v59  ;;  %v267_v45 = vld [vmem:[#allocation6 + $0xe0] sm:$0xff] }
  0x78   :  { %1412 = vmatpush1.bf16.msra.mxu1 %v2107_v60  ;;  %221 = vmatpush1.bf16.msra.mxu0 %v2210_v61  ;;  %v368_v60 = vld [vmem:[#allocation6 + $0x408] sm:$0xff] }
  0x79   :  { %1413 = vmatprep.subr.bf16.mxu1 %v2124_v62  ;;  %1434 = vmatprep.subr.bf16.mxu0 %v1950_v63  ;;  %v376_v61 = vld [vmem:[#allocation6 + $0x448] sm:$0xff]  ;;  %v2047_v62 = vcombine.low %v337_v50, %v345_v51  ;;  %v2061_v63 = vcombine.low %v352_v52, %v360_v53  ;;  %v1972_v50 = vcombine.high %v259_v44, %v267_v45  ;;  %v275_v52 = vld [vmem:[#allocation6 + $0x120] sm:$0xff] }
  0x7a   :  { %v2078_v2 = vcombine.high %v368_v60, %v376_v61  ;;  %v283_v53 = vld [vmem:[#allocation6 + $0x160] sm:$0xff] }
  0x7b   :  { %231 = vmatmul.mubr.bf16.vlgmr.msra.gmra.mrb[0].mxu0 %v2461_v6 }
  0x7c   :  { %1414 = vmatpush1.bf16.msra.mxu1 %v2123_v5  ;;  %1435 = vmatpush1.bf16.msra.mxu0 %v1949_v7  ;;  %v384_v5 = vld [vmem:[#allocation6 + $0x488] sm:$0xff] }
  0x7d   :  { %1477 = vmatprep.subr.bf16.mxu1 %v1952_v8  ;;  %1436 = vmatprep.subr.bf16.mxu0 %v1966_v9  ;;  %v392_v7 = vld [vmem:[#allocation6 + $0x4c8] sm:$0xff]  ;;  %v2063_v8 = vcombine.low %v353_v57, %v361_v59  ;;  %v2077_v9 = vcombine.low %v368_v60, %v376_v61  ;;  %v291_v60 = vld [vmem:[#allocation6 + $0x1a0] sm:$0xff] }
  0x7e   :  { %2140 = vmatprep.mubr.msk.bf16.mxu0 %vm194_vm0, %v2449_v32  ;;  %v2094_v11 = vcombine.high %v384_v5, %v392_v7  ;;  %v299_v61 = vld [vmem:[#allocation6 + $0x1e0] sm:$0xff] }
  0x7f   :  { %1424 = vmatmul.mubr.bf16.vlgmr.msra.gmra.mrb[0].mxu1 %v2461_v6 }
  0x80   :  { %1478 = vmatpush1.bf16.msra.mxu1 %v1951_v0  ;;  %2141 = vmatprep.mubr.msk.bf16.mxu1 %vm194_vm0, %v2449_v32  ;;  %v400_v0 = vld [vmem:[#allocation6 + $0x508] sm:$0xff] }
  0x81   :  { %1437 = vmatpush1.bf16.msra.mxu0 %v1965_v14  ;;  %1479 = vmatprep.subr.bf16.mxu1 %v1968_v15  ;;  %v408_v14 = vld [vmem:[#allocation6 + $0x548] sm:$0xff]  ;;  %v2079_v15 = vcombine.low %v369_v3, %v377_v4  ;;  %v2004_v3 = vcombine.high %v291_v60, %v299_v61 }
  0x82   :  { %1438 = vmatprep.subr.bf16.mxu0 %v1982_v16  ;;  %v2093_v16 = vcombine.low %v384_v5, %v392_v7  ;;  %v2110_v18 = vcombine.high %v400_v0, %v408_v14  ;;  %v307_v5 = vld [vmem:[#allocation6 + $0x220] sm:$0xff] }
  0x83   :  { %v315_v7 = vld [vmem:[#allocation6 + $0x260] sm:$0xff] }
  0x84   :  { %1480 = vmatpush1.bf16.msra.mxu1 %v1967_v21  ;;  %v416_v21 = vld [vmem:[#allocation6 + $0x588] sm:$0xff] }
  0x85   :  { %1439 = vmatpush1.bf16.msra.mxu0 %v1981_v22  ;;  %1481 = vmatprep.subr.bf16.mxu1 %v1984_v23  ;;  %v424_v22 = vld [vmem:[#allocation6 + $0x5c8] sm:$0xff]  ;;  %v2095_v23 = vcombine.low %v385_v12, %v393_v13  ;;  %v2020_v12 = vcombine.high %v307_v5, %v315_v7 }
  0x86   :  { %1440 = vmatprep.subr.bf16.mxu0 %v1998_v24  ;;  %v2109_v24 = vcombine.low %v400_v0, %v408_v14  ;;  %v2126_v26 = vcombine.high %v416_v21, %v424_v22  ;;  %v323_v0 = vld [vmem:[#allocation6 + $0x2a0] sm:$0xff] }
  0x87   :  { %v331_v14 = vld [vmem:[#allocation6 + $0x2e0] sm:$0xff] }
  0x88   :  { %1482 = vmatpush1.bf16.msra.mxu1 %v1983_v29  ;;  %v242_v29 = vld [vmem:[#allocation6 + $0x18] sm:$0xff] }
  0x89   :  { %1441 = vmatpush1.bf16.msra.mxu0 %v1997_v30  ;;  %1483 = vmatprep.subr.bf16.mxu1 %v2000_v31  ;;  %v250_v30 = vld [vmem:[#allocation6 + $0x58] sm:$0xff]  ;;  %v2111_v31 = vcombine.low %v401_v19, %v409_v20  ;;  %v2036_v19 = vcombine.high %v323_v0, %v331_v14 }
  0x8a   :  { %1442 = vmatprep.subr.bf16.mxu0 %v2014_v33  ;;  %v2125_v33 = vcombine.low %v416_v21, %v424_v22  ;;  %v1954_v35 = vcombine.high %v242_v29, %v250_v30  ;;  %v339_v21 = vld [vmem:[#allocation6 + $0x320] sm:$0xff] }
  0x8b   :  { %v347_v22 = vld [vmem:[#allocation6 + $0x360] sm:$0xff] }
  0x8c   :  { %1484 = vmatpush1.bf16.msra.mxu1 %v1999_v38  ;;  %v258_v38 = vld [vmem:[#allocation6 + $0x98] sm:$0xff] }
  0x8d   :  { %1443 = vmatpush1.bf16.msra.mxu0 %v2013_v39  ;;  %1485 = vmatprep.subr.bf16.mxu1 %v2016_v40  ;;  %v266_v39 = vld [vmem:[#allocation6 + $0xd8] sm:$0xff]  ;;  %v2127_v40 = vcombine.low %v417_v27, %v425_v28  ;;  %v2052_v27 = vcombine.high %v339_v21, %v347_v22 }
  0x8e   :  { %1444 = vmatprep.subr.bf16.mxu0 %v2030_v41  ;;  %v1953_v41 = vcombine.low %v242_v29, %v250_v30  ;;  %v1970_v43 = vcombine.high %v258_v38, %v266_v39  ;;  %v355_v29 = vld [vmem:[#allocation6 + $0x3a0] sm:$0xff] }
  0x8f   :  { %v363_v30 = vld [vmem:[#allocation6 + $0x3e0] sm:$0xff] }
  0x90   :  { %1486 = vmatpush1.bf16.msra.mxu1 %v2015_v46  ;;  %v274_v46 = vld [vmem:[#allocation6 + $0x118] sm:$0xff] }
  0x91   :  { %1445 = vmatpush1.bf16.msra.mxu0 %v2029_v47  ;;  %1487 = vmatprep.subr.bf16.mxu1 %v2032_v48  ;;  %v282_v47 = vld [vmem:[#allocation6 + $0x158] sm:$0xff]  ;;  %v1955_v48 = vcombine.low %v243_v36, %v251_v37  ;;  %v2068_v36 = vcombine.high %v355_v29, %v363_v30 }
  0x92   :  { %1446 = vmatprep.subr.bf16.mxu0 %v2046_v49  ;;  %v1969_v49 = vcombine.low %v258_v38, %v266_v39  ;;  %v1986_v51 = vcombine.high %v274_v46, %v282_v47  ;;  %v1985_v57 = vcombine.low %v274_v46, %v282_v47  ;;  %v371_v38 = vld [vmem:[#allocation6 + $0x420] sm:$0xff] }
  0x93   :  { %v379_v39 = vld [vmem:[#allocation6 + $0x460] sm:$0xff] }
  0x94   :  { %1488 = vmatpush1.bf16.msra.mxu1 %v2031_v54  ;;  %v290_v54 = vld [vmem:[#allocation6 + $0x198] sm:$0xff]  ;;  %v387_v46 = vld [vmem:[#allocation6 + $0x4a0] sm:$0xff] }
  0x95   :  { %1447 = vmatpush1.bf16.msra.mxu0 %v2045_v55  ;;  %1489 = vmatprep.subr.bf16.mxu1 %v2048_v56  ;;  %v298_v55 = vld [vmem:[#allocation6 + $0x1d8] sm:$0xff]  ;;  %v1971_v56 = vcombine.low %v259_v44, %v267_v45  ;;  %v2084_v44 = vcombine.high %v371_v38, %v379_v39  ;;  %v395_v47 = vld [vmem:[#allocation6 + $0x4e0] sm:$0xff] }
  0x96   :  { %1448 = vmatprep.subr.bf16.mxu0 %v2062_v58  ;;  %v1988_v58 = vcombine.high %v275_v52, %v283_v53  ;;  %v2002_v59 = vcombine.high %v290_v54, %v298_v55 }
  0x98   :  { %1490 = vmatpush1.bf16.msra.mxu1 %v2047_v62  ;;  %v306_v62 = vld [vmem:[#allocation6 + $0x218] sm:$0xff] }
  0x99   :  { %1449 = vmatpush1.bf16.msra.mxu0 %v2061_v63  ;;  %1491 = vmatprep.subr.bf16.mxu1 %v2064_v1  ;;  %v314_v63 = vld [vmem:[#allocation6 + $0x258] sm:$0xff]  ;;  %v1987_v1 = vcombine.low %v275_v52, %v283_v53  ;;  %v2100_v52 = vcombine.high %v387_v46, %v395_v47 }
  0x9a   :  { %1450 = vmatprep.subr.bf16.mxu0 %v2078_v2  ;;  %v2001_v2 = vcombine.low %v290_v54, %v298_v55  ;;  %v2018_v4 = vcombine.high %v306_v62, %v314_v63  ;;  %v403_v54 = vld [vmem:[#allocation6 + $0x520] sm:$0xff] }
  0x9b   :  { %v411_v55 = vld [vmem:[#allocation6 + $0x560] sm:$0xff] }
  0x9c   :  { %1492 = vmatpush1.bf16.msra.mxu1 %v2063_v8  ;;  %v322_v8 = vld [vmem:[#allocation6 + $0x298] sm:$0xff] }
  0x9d   :  { %1451 = vmatpush1.bf16.msra.mxu0 %v2077_v9  ;;  %1493 = vmatprep.subr.bf16.mxu1 %v2080_v10  ;;  %v330_v9 = vld [vmem:[#allocation6 + $0x2d8] sm:$0xff]  ;;  %v2003_v10 = vcombine.low %v291_v60, %v299_v61  ;;  %v2116_v60 = vcombine.high %v403_v54, %v411_v55 }
  0x9e   :  { %1452 = vmatprep.subr.bf16.mxu0 %v2094_v11  ;;  %v2017_v11 = vcombine.low %v306_v62, %v314_v63  ;;  %v2034_v13 = vcombine.high %v322_v8, %v330_v9  ;;  %v419_v62 = vld [vmem:[#allocation6 + $0x5a0] sm:$0xff] }
  0x9f   :  { %v427_v63 = vld [vmem:[#allocation6 + $0x5e0] sm:$0xff] }
  0xa0   :  { %1494 = vmatpush1.bf16.msra.mxu1 %v2079_v15  ;;  %v338_v15 = vld [vmem:[#allocation6 + $0x318] sm:$0xff] }
  0xa1   :  { %1453 = vmatpush1.bf16.msra.mxu0 %v2093_v16  ;;  %1495 = vmatprep.subr.bf16.mxu1 %v2096_v17  ;;  %v346_v16 = vld [vmem:[#allocation6 + $0x358] sm:$0xff]  ;;  %v2019_v17 = vcombine.low %v307_v5, %v315_v7  ;;  %v2132_v5 = vcombine.high %v419_v62, %v427_v63 }
  0xa2   :  { %1454 = vmatprep.subr.bf16.mxu0 %v2110_v18  ;;  %v2033_v18 = vcombine.low %v322_v8, %v330_v9  ;;  %v2050_v20 = vcombine.high %v338_v15, %v346_v16  ;;  %v245_v8 = vld [vmem:[#allocation6 + $0x30] sm:$0xff] }
  0xa3   :  { %v253_v9 = vld [vmem:[#allocation6 + $0x70] sm:$0xff] }
  0xa4   :  { %1496 = vmatpush1.bf16.msra.mxu1 %v2095_v23  ;;  %v354_v23 = vld [vmem:[#allocation6 + $0x398] sm:$0xff] }
  0xa5   :  { %1455 = vmatpush1.bf16.msra.mxu0 %v2109_v24  ;;  %1497 = vmatprep.subr.bf16.mxu1 %v2112_v25  ;;  %v362_v24 = vld [vmem:[#allocation6 + $0x3d8] sm:$0xff]  ;;  %v2035_v25 = vcombine.low %v323_v0, %v331_v14  ;;  %v1960_v0 = vcombine.high %v245_v8, %v253_v9 }
  0xa6   :  { %1456 = vmatprep.subr.bf16.mxu0 %v2126_v26  ;;  %v2049_v26 = vcombine.low %v338_v15, %v346_v16  ;;  %v2066_v28 = vcombine.high %v354_v23, %v362_v24  ;;  %v261_v15 = vld [vmem:[#allocation6 + $0xb0] sm:$0xff] }
  0xa7   :  { %v269_v16 = vld [vmem:[#allocation6 + $0xf0] sm:$0xff] }
  0xa8   :  { %1498 = vmatpush1.bf16.msra.mxu1 %v2111_v31  ;;  %v370_v31 = vld [vmem:[#allocation6 + $0x418] sm:$0xff] }
  0xa9   :  { %1457 = vmatpush1.bf16.msra.mxu0 %v2125_v33  ;;  %1499 = vmatprep.subr.bf16.mxu1 %v2128_v34  ;;  %v378_v33 = vld [vmem:[#allocation6 + $0x458] sm:$0xff]  ;;  %v2051_v34 = vcombine.low %v339_v21, %v347_v22  ;;  %v1976_v21 = vcombine.high %v261_v15, %v269_v16 }
  0xaa   :  { %1520 = vmatprep.subr.bf16.mxu0 %v1954_v35  ;;  %v2065_v35 = vcombine.low %v354_v23, %v362_v24  ;;  %v2082_v37 = vcombine.high %v370_v31, %v378_v33  ;;  %v277_v23 = vld [vmem:[#allocation6 + $0x130] sm:$0xff] }
  0xab   :  { %v285_v24 = vld [vmem:[#allocation6 + $0x170] sm:$0xff] }
  0xac   :  { %1500 = vmatpush1.bf16.msra.mxu1 %v2127_v40  ;;  %1467 = vmatmul.mubr.bf16.vlgmr.msra.gmra.mrb[4].mxu0 %v2461_v6  ;;  %v386_v40 = vld [vmem:[#allocation6 + $0x498] sm:$0xff] }
  0xad   :  { %1521 = vmatpush1.bf16.msra.mxu0 %v1953_v41  ;;  %1563 = vmatprep.subr.bf16.mxu1 %v1956_v42  ;;  %v394_v41 = vld [vmem:[#allocation6 + $0x4d8] sm:$0xff]  ;;  %v2067_v42 = vcombine.low %v355_v29, %v363_v30  ;;  %v1992_v29 = vcombine.high %v277_v23, %v285_v24 }
  0xae   :  { %1522 = vmatprep.subr.bf16.mxu0 %v1970_v43  ;;  %2142 = vmatprep.mubr.msk.bf16.mxu0 %vm194_vm0, %v2449_v32  ;;  %v2081_v43 = vcombine.low %v370_v31, %v378_v33  ;;  %v2098_v45 = vcombine.high %v386_v40, %v394_v41  ;;  %v293_v31 = vld [vmem:[#allocation6 + $0x1b0] sm:$0xff] }
  0xaf   :  { %1510 = vmatmul.mubr.bf16.vlgmr.msra.gmra.mrb[4].mxu1 %v2461_v6  ;;  %v301_v33 = vld [vmem:[#allocation6 + $0x1f0] sm:$0xff] }
  0xb0   :  { %1564 = vmatpush1.bf16.msra.mxu1 %v1955_v48  ;;  %2143 = vmatprep.mubr.msk.bf16.mxu1 %vm194_vm0, %v2449_v32  ;;  %v402_v48 = vld [vmem:[#allocation6 + $0x518] sm:$0xff] }
  0xb1   :  { %1523 = vmatpush1.bf16.msra.mxu0 %v1969_v49  ;;  %1565 = vmatprep.subr.bf16.mxu1 %v1972_v50  ;;  %v410_v49 = vld [vmem:[#allocation6 + $0x558] sm:$0xff]  ;;  %v2083_v50 = vcombine.low %v371_v38, %v379_v39  ;;  %v2008_v38 = vcombine.high %v293_v31, %v301_v33 }
  0xb2   :  { %1524 = vmatprep.subr.bf16.mxu0 %v1986_v51  ;;  %v2097_v51 = vcombine.low %v386_v40, %v394_v41  ;;  %v2114_v53 = vcombine.high %v402_v48, %v410_v49  ;;  %v309_v40 = vld [vmem:[#allocation6 + $0x230] sm:$0xff]  ;;  %v324_v41 = vld [vmem:[#allocation6 + $0x2a8] sm:$0xff] }
  0xb4   :  { %1566 = vmatpush1.bf16.msra.mxu1 %v1971_v56  ;;  %v418_v56 = vld [vmem:[#allocation6 + $0x598] sm:$0xff] }
  0xb5   :  { %1525 = vmatpush1.bf16.msra.mxu0 %v1985_v57  ;;  %1567 = vmatprep.subr.bf16.mxu1 %v1988_v58  ;;  %v426_v57 = vld [vmem:[#allocation6 + $0x5d8] sm:$0xff]  ;;  %v2099_v58 = vcombine.low %v387_v46, %v395_v47  ;;  %v325_v47 = vld [vmem:[#allocation6 + $0x2b0] sm:$0xff] }
  0xb6   :  { %1526 = vmatprep.subr.bf16.mxu0 %v2002_v59  ;;  %v2113_v59 = vcombine.low %v402_v48, %v410_v49  ;;  %v2130_v61 = vcombine.high %v418_v56, %v426_v57  ;;  %v333_v48 = vld [vmem:[#allocation6 + $0x2f0] sm:$0xff]  ;;  %v340_v49 = vld [vmem:[#allocation6 + $0x328] sm:$0xff] }
  0xb8   :  { %1568 = vmatpush1.bf16.msra.mxu1 %v1987_v1  ;;  %v244_v1 = vld [vmem:[#allocation6 + $0x28] sm:$0xff] }
  0xb9   :  { %1527 = vmatpush1.bf16.msra.mxu0 %v2001_v2  ;;  %1569 = vmatprep.subr.bf16.mxu1 %v2004_v3  ;;  %v252_v2 = vld [vmem:[#allocation6 + $0x68] sm:$0xff]  ;;  %v2115_v3 = vcombine.low %v403_v54, %v411_v55  ;;  %v341_v55 = vld [vmem:[#allocation6 + $0x330] sm:$0xff] }
  0xba   :  { %1528 = vmatprep.subr.bf16.mxu0 %v2018_v4  ;;  %v2129_v4 = vcombine.low %v418_v56, %v426_v57  ;;  %v1958_v7 = vcombine.high %v244_v1, %v252_v2  ;;  %v349_v56 = vld [vmem:[#allocation6 + $0x370] sm:$0xff]  ;;  %v356_v57 = vld [vmem:[#allocation6 + $0x3a8] sm:$0xff] }
  0xbc   :  { %1570 = vmatpush1.bf16.msra.mxu1 %v2003_v10  ;;  %v260_v10 = vld [vmem:[#allocation6 + $0xa8] sm:$0xff] }
  0xbd   :  { %1529 = vmatpush1.bf16.msra.mxu0 %v2017_v11  ;;  %1571 = vmatprep.subr.bf16.mxu1 %v2020_v12  ;;  %v268_v11 = vld [vmem:[#allocation6 + $0xe8] sm:$0xff]  ;;  %v2131_v12 = vcombine.low %v419_v62, %v427_v63  ;;  %v357_v63 = vld [vmem:[#allocation6 + $0x3b0] sm:$0xff] }
  0xbe   :  { %1530 = vmatprep.subr.bf16.mxu0 %v2034_v13  ;;  %v1957_v13 = vcombine.low %v244_v1, %v252_v2  ;;  %v1974_v14 = vcombine.high %v260_v10, %v268_v11  ;;  %v365_v1 = vld [vmem:[#allocation6 + $0x3f0] sm:$0xff]  ;;  %v372_v2 = vld [vmem:[#allocation6 + $0x428] sm:$0xff] }
  0xc0   :  { %1572 = vmatpush1.bf16.msra.mxu1 %v2019_v17  ;;  %v276_v17 = vld [vmem:[#allocation6 + $0x128] sm:$0xff] }
  0xc1   :  { %1531 = vmatpush1.bf16.msra.mxu0 %v2033_v18  ;;  %1573 = vmatprep.subr.bf16.mxu1 %v2036_v19  ;;  %v284_v18 = vld [vmem:[#allocation6 + $0x168] sm:$0xff]  ;;  %v1959_v19 = vcombine.low %v245_v8, %v253_v9  ;;  %v373_v9 = vld [vmem:[#allocation6 + $0x430] sm:$0xff] }
  0xc2   :  { %1532 = vmatprep.subr.bf16.mxu0 %v2050_v20  ;;  %v1973_v20 = vcombine.low %v260_v10, %v268_v11  ;;  %v1990_v22 = vcombine.high %v276_v17, %v284_v18  ;;  %v381_v10 = vld [vmem:[#allocation6 + $0x470] sm:$0xff]  ;;  %v388_v11 = vld [vmem:[#allocation6 + $0x4a8] sm:$0xff] }
  0xc4   :  { %1574 = vmatpush1.bf16.msra.mxu1 %v2035_v25  ;;  %v292_v25 = vld [vmem:[#allocation6 + $0x1a8] sm:$0xff] }
  0xc5   :  { %1533 = vmatpush1.bf16.msra.mxu0 %v2049_v26  ;;  %1575 = vmatprep.subr.bf16.mxu1 %v2052_v27  ;;  %v300_v26 = vld [vmem:[#allocation6 + $0x1e8] sm:$0xff]  ;;  %v1975_v27 = vcombine.low %v261_v15, %v269_v16  ;;  %v389_v16 = vld [vmem:[#allocation6 + $0x4b0] sm:$0xff] }
  0xc6   :  { %1534 = vmatprep.subr.bf16.mxu0 %v2066_v28  ;;  %v1989_v28 = vcombine.low %v276_v17, %v284_v18  ;;  %v2006_v30 = vcombine.high %v292_v25, %v300_v26  ;;  %v397_v17 = vld [vmem:[#allocation6 + $0x4f0] sm:$0xff]  ;;  %v404_v18 = vld [vmem:[#allocation6 + $0x528] sm:$0xff] }
  0xc8   :  { %1576 = vmatpush1.bf16.msra.mxu1 %v2051_v34  ;;  %v308_v34 = vld [vmem:[#allocation6 + $0x228] sm:$0xff] }
  0xc9   :  { %1535 = vmatpush1.bf16.msra.mxu0 %v2065_v35  ;;  %1577 = vmatprep.subr.bf16.mxu1 %v2068_v36  ;;  %v316_v35 = vld [vmem:[#allocation6 + $0x268] sm:$0xff]  ;;  %v1991_v36 = vcombine.low %v277_v23, %v285_v24  ;;  %v405_v24 = vld [vmem:[#allocation6 + $0x530] sm:$0xff] }
  0xca   :  { %1536 = vmatprep.subr.bf16.mxu0 %v2082_v37  ;;  %v2005_v37 = vcombine.low %v292_v25, %v300_v26  ;;  %v2022_v39 = vcombine.high %v308_v34, %v316_v35  ;;  %v413_v25 = vld [vmem:[#allocation6 + $0x570] sm:$0xff]  ;;  %v420_v26 = vld [vmem:[#allocation6 + $0x5a8] sm:$0xff] }
  0xcc   :  { %1578 = vmatpush1.bf16.msra.mxu1 %v2067_v42  ;;  %v332_v42 = vld [vmem:[#allocation6 + $0x2e8] sm:$0xff] }
  0xcd   :  { %1537 = vmatpush1.bf16.msra.mxu0 %v2081_v43  ;;  %1579 = vmatprep.subr.bf16.mxu1 %v2084_v44  ;;  %v2007_v43 = vcombine.low %v293_v31, %v301_v33  ;;  %v2021_v44 = vcombine.low %v308_v34, %v316_v35  ;;  %v2038_v46 = vcombine.high %v324_v41, %v332_v42  ;;  %v421_v33 = vld [vmem:[#allocation6 + $0x5b0] sm:$0xff]  ;;  %v246_v35 = vld [vmem:[#allocation6 + $0x38] sm:$0xff] }
  0xce   :  { %1538 = vmatprep.subr.bf16.mxu0 %v2098_v45  ;;  %v429_v34 = vld [vmem:[#allocation6 + $0x5f0] sm:$0xff] }
  0xd0   :  { %1580 = vmatpush1.bf16.msra.mxu1 %v2083_v50  ;;  %v348_v50 = vld [vmem:[#allocation6 + $0x368] sm:$0xff] }
  0xd1   :  { %1539 = vmatpush1.bf16.msra.mxu0 %v2097_v51  ;;  %1581 = vmatprep.subr.bf16.mxu1 %v2100_v52  ;;  %v2037_v52 = vcombine.low %v324_v41, %v332_v42  ;;  %v2054_v54 = vcombine.high %v340_v49, %v348_v50  ;;  %v270_v41 = vld [vmem:[#allocation6 + $0xf8] sm:$0xff]  ;;  %v2135_v42 = vcombine.low %v421_v33, %v429_v34 }
  0xd2   :  { %1540 = vmatprep.subr.bf16.mxu0 %v2114_v53  ;;  %v2040_v53 = vcombine.high %v325_v47, %v333_v48 }
  0xd4   :  { %1582 = vmatpush1.bf16.msra.mxu1 %v2099_v58  ;;  %v364_v58 = vld [vmem:[#allocation6 + $0x3e8] sm:$0xff] }
  0xd5   :  { %1541 = vmatpush1.bf16.msra.mxu0 %v2113_v59  ;;  %1583 = vmatprep.subr.bf16.mxu1 %v2116_v60  ;;  %v2039_v59 = vcombine.low %v325_v47, %v333_v48  ;;  %v2053_v60 = vcombine.low %v340_v49, %v348_v50  ;;  %v2070_v62 = vcombine.high %v356_v57, %v364_v58  ;;  %v2217_v48 = vld [vmem:[#allocation3 + $0x4] ss:$8 sps:$4 sm:$0xff]  }
  0xd6   :  { %1542 = vmatprep.subr.bf16.mxu0 %v2130_v61  ;;  %v2056_v61 = vcombine.high %v341_v55, %v349_v56  ;;  %v294_v50 = vld [vmem:[#allocation6 + $0x1b8] sm:$0xff] }
  0xd8   :  { %1584 = vmatpush1.bf16.msra.mxu1 %v2115_v3  ;;  %v380_v3 = vld [vmem:[#allocation6 + $0x468] sm:$0xff] }
  0xd9   :  { %1543 = vmatpush1.bf16.msra.mxu0 %v2129_v4  ;;  %1585 = vmatprep.subr.bf16.mxu1 %v2132_v5  ;;  %v2055_v4 = vcombine.low %v341_v55, %v349_v56  ;;  %v2069_v5 = vcombine.low %v356_v57, %v364_v58  ;;  %v2086_v8 = vcombine.high %v372_v2, %v380_v3  ;;  %v318_v55 = vld [vmem:[#allocation6 + $0x278] sm:$0xff] }
  0xda   :  { %1606 = vmatprep.subr.bf16.mxu0 %v1958_v7  ;;  %v2072_v7 = vcombine.high %v357_v63, %v365_v1  ;;  %v326_v58 = vld [vmem:[#allocation6 + $0x2b8] sm:$0xff] }
  0xdc   :  { %1586 = vmatpush1.bf16.msra.mxu1 %v2131_v12  ;;  %1553 = vmatmul.mubr.bf16.vlgmr.msra.gmra.mrb[8].mxu0 %v2461_v6  ;;  %v396_v12 = vld [vmem:[#allocation6 + $0x4e8] sm:$0xff] }
  0xdd   :  { %1607 = vmatpush1.bf16.msra.mxu0 %v1957_v13  ;;  %1649 = vmatprep.subr.bf16.mxu1 %v1960_v0  ;;  %v2071_v13 = vcombine.low %v357_v63, %v365_v1  ;;  %v2085_v0 = vcombine.low %v372_v2, %v380_v3  ;;  %v2102_v15 = vcombine.high %v388_v11, %v396_v12  ;;  %v358_v2 = vld [vmem:[#allocation6 + $0x3b8] sm:$0xff] }
  0xde   :  { %1608 = vmatprep.subr.bf16.mxu0 %v1974_v14  ;;  %2144 = vmatprep.mubr.msk.bf16.mxu0 %vm194_vm0, %v2449_v32  ;;  %v2088_v14 = vcombine.high %v373_v9, %v381_v10  ;;  %v366_v3 = vld [vmem:[#allocation6 + $0x3f8] sm:$0xff] }
  0xdf   :  { %1596 = vmatmul.mubr.bf16.vlgmr.msra.gmra.mrb[8].mxu1 %v2461_v6 }
  0xe0   :  { %1650 = vmatpush1.bf16.msra.mxu1 %v1959_v19  ;;  %2145 = vmatprep.mubr.msk.bf16.mxu1 %vm194_vm0, %v2449_v32  ;;  %v317_v32 = vld [vmem:[#allocation6 + $0x270] sm:$0xff]  ;;  %v412_v19 = vld [vmem:[#allocation6 + $0x568] sm:$0xff] }
  0xe1   :  { %1609 = vmatpush1.bf16.msra.mxu0 %v1973_v20  ;;  %1651 = vmatprep.subr.bf16.mxu1 %v1976_v21  ;;  %v2024_v45 = vcombine.high %v309_v40, %v317_v32  ;;  %v2023_v51 = vcombine.low %v309_v40, %v317_v32  ;;  %v2087_v20 = vcombine.low %v373_v9, %v381_v10  ;;  %v262_v32 = vld [vmem:[#allocation6 + $0xb8] sm:$0xff] }
  0xe2   :  { %1610 = vmatprep.subr.bf16.mxu0 %v1990_v22  ;;  %v2101_v21 = vcombine.low %v388_v11, %v396_v12  ;;  %v2104_v22 = vcombine.high %v389_v16, %v397_v17  ;;  %v2118_v23 = vcombine.high %v404_v18, %v412_v19  ;;  %v1977_v47 = vcombine.low %v262_v32, %v270_v41  ;;  %v390_v11 = vld [vmem:[#allocation6 + $0x4b8] sm:$0xff] }
  0xe3   :  { %v2073_v9 = vcombine.low %v358_v2, %v366_v3  ;;  %v398_v12 = vld [vmem:[#allocation6 + $0x4f8] sm:$0xff] }
  0xe4   :  { %1652 = vmatpush1.bf16.msra.mxu1 %v1975_v27  ;;  %v428_v27 = vld [vmem:[#allocation6 + $0x5e8] sm:$0xff] }
  0xe5   :  { %1611 = vmatpush1.bf16.msra.mxu0 %v1989_v28  ;;  %1653 = vmatprep.subr.bf16.mxu1 %v1992_v29  ;;  %v2103_v28 = vcombine.low %v389_v16, %v397_v17  ;;  %v2117_v29 = vcombine.low %v404_v18, %v412_v19  ;;  %v2134_v31 = vcombine.high %v420_v26, %v428_v27  ;;  %v422_v18 = vld [vmem:[#allocation6 + $0x5b8] sm:$0xff] }
  0xe6   :  { %1612 = vmatprep.subr.bf16.mxu0 %v2006_v30  ;;  %v2120_v30 = vcombine.high %v405_v24, %v413_v25  ;;  %v2105_v16 = vcombine.low %v390_v11, %v398_v12  ;;  %v430_v19 = vld [vmem:[#allocation6 + $0x5f8] sm:$0xff] }
  0xe8   :  { %1654 = vmatpush1.bf16.msra.mxu1 %v1991_v36  ;;  %v254_v36 = vld [vmem:[#allocation6 + $0x78] sm:$0xff] }
  0xe9   :  { %1613 = vmatpush1.bf16.msra.mxu0 %v2005_v37  ;;  %1655 = vmatprep.subr.bf16.mxu1 %v2008_v38  ;;  %v2119_v37 = vcombine.low %v405_v24, %v413_v25  ;;  %v2133_v38 = vcombine.low %v420_v26, %v428_v27  ;;  %v1962_v40 = vcombine.high %v246_v35, %v254_v36 }
  0xea   :  { %1614 = vmatprep.subr.bf16.mxu0 %v2022_v39  ;;  %v2136_v39 = vcombine.high %v421_v33, %v429_v34 }
  0xec   :  { %1656 = vmatpush1.bf16.msra.mxu1 %v2007_v43  ;;  %v1961_v43 = vcombine.low %v246_v35, %v254_v36 }
  0xed   :  { %1615 = vmatpush1.bf16.msra.mxu0 %v2021_v44  ;;  %1657 = vmatprep.subr.bf16.mxu1 %v2024_v45  ;;  %v1978_v44 = vcombine.high %v262_v32, %v270_v41  ;;  %v278_v45 = vld [vmem:[#allocation6 + $0x138] sm:$0xff] }
  0xee   :  { %1616 = vmatprep.subr.bf16.mxu0 %v2038_v46  ;;  %v286_v46 = vld [vmem:[#allocation6 + $0x178] sm:$0xff] }
  0xef   :  { %v1994_v49 = vcombine.high %v278_v45, %v286_v46 }
  0xf0   :  { %1658 = vmatpush1.bf16.msra.mxu1 %v2023_v51  ;;  %v302_v51 = vld [vmem:[#allocation6 + $0x1f8] sm:$0xff] }
  0xf1   :  { %1617 = vmatpush1.bf16.msra.mxu0 %v2037_v52  ;;  %1659 = vmatprep.subr.bf16.mxu1 %v2040_v53  ;;  %v1993_v52 = vcombine.low %v278_v45, %v286_v46  ;;  %v2010_v53 = vcombine.high %v294_v50, %v302_v51  ;;  %v2009_v56 = vcombine.low %v294_v50, %v302_v51  ;;  %v2216_v46 = vld [vmem:[#allocation9 + $0x4] ss:$8 sps:$4 sm:$0xff]  }
  0xf2   :  { %1618 = vmatprep.subr.bf16.mxu0 %v2054_v54  ;;  %v310_v54 = vld [vmem:[#allocation6 + $0x238] sm:$0xff] }
  0xf3   :  { %v2026_v57 = vcombine.high %v310_v54, %v318_v55 }
  0xf4   :  { %1660 = vmatpush1.bf16.msra.mxu1 %v2039_v59  ;;  %v334_v59 = vld [vmem:[#allocation6 + $0x2f8] sm:$0xff] }
  0xf5   :  { %1619 = vmatpush1.bf16.msra.mxu0 %v2053_v60  ;;  %1661 = vmatprep.subr.bf16.mxu1 %v2056_v61  ;;  %v2025_v60 = vcombine.low %v310_v54, %v318_v55  ;;  %v2042_v61 = vcombine.high %v326_v58, %v334_v59  ;;  %v2041_v63 = vcombine.low %v326_v58, %v334_v59 }
  0xf6   :  { %1620 = vmatprep.subr.bf16.mxu0 %v2070_v62  ;;  %v342_v62 = vld [vmem:[#allocation6 + $0x338] sm:$0xff] }
  0xf8   :  { %1662 = vmatpush1.bf16.msra.mxu1 %v2055_v4 }
  0xf9   :  { %1621 = vmatpush1.bf16.msra.mxu0 %v2069_v5  ;;  %1663 = vmatprep.subr.bf16.mxu1 %v2072_v7  ;;  %v2074_v5 = vcombine.high %v358_v2, %v366_v3  ;;  %v374_v7 = vld [vmem:[#allocation6 + $0x438] sm:$0xff] }
  0xfa   :  { %1622 = vmatprep.subr.bf16.mxu0 %v2086_v8  ;;  %v382_v8 = vld [vmem:[#allocation6 + $0x478] sm:$0xff] }
  0xfb   :  { %v2090_v10 = vcombine.high %v374_v7, %v382_v8 }
  0xfc   :  { %1664 = vmatpush1.bf16.msra.mxu1 %v2071_v13  ;;  %v2089_v13 = vcombine.low %v374_v7, %v382_v8 }
  0xfd   :  { %1623 = vmatpush1.bf16.msra.mxu0 %v2085_v0  ;;  %1665 = vmatprep.subr.bf16.mxu1 %v2088_v14  ;;  %v2106_v0 = vcombine.high %v390_v11, %v398_v12  ;;  %v406_v14 = vld [vmem:[#allocation6 + $0x538] sm:$0xff] }
  0xfe   :  { %1624 = vmatprep.subr.bf16.mxu0 %v2102_v15  ;;  %v414_v15 = vld [vmem:[#allocation6 + $0x578] sm:$0xff] }
  0xff   :  { %v2122_v17 = vcombine.high %v406_v14, %v414_v15 }
 0x100   :  { %1666 = vmatpush1.bf16.msra.mxu1 %v2087_v20  ;;  %v2121_v20 = vcombine.low %v406_v14, %v414_v15  ;;  %v2347_v14 = vmov 0.0|0.0   ;;  %v2349_v15 = vmov 0.0  }
 0x101   :  { %1625 = vmatpush1.bf16.msra.mxu0 %v2101_v21  ;;  %1667 = vmatprep.subr.bf16.mxu1 %v2104_v22  ;;  %v2138_v21 = vcombine.high %v422_v18, %v430_v19  ;;  %v2137_v22 = vcombine.low %v422_v18, %v430_v19 }
 0x102   :  { %1626 = vmatprep.subr.bf16.mxu0 %v2118_v23  ;;  %v2218_v23 = vld [vmem:[#allocation3] ss:$8 sps:$4 sm:$0xff]  }
 0x104   :  { %1668 = vmatpush1.bf16.msra.mxu1 %v2103_v28 }
 0x105   :  { %1627 = vmatpush1.bf16.msra.mxu0 %v2117_v29  ;;  %1669 = vmatprep.subr.bf16.mxu1 %v2120_v30 }
 0x106   :  { %1628 = vmatprep.subr.bf16.mxu0 %v2134_v31 }
 0x108   :  { %1670 = vmatpush1.bf16.msra.mxu1 %v2119_v37 }
 0x109   :  { %1629 = vmatpush1.bf16.msra.mxu0 %v2133_v38  ;;  %1671 = vmatprep.subr.bf16.mxu1 %v2136_v39 }
 0x10a   :  { %1692 = vmatprep.subr.bf16.mxu0 %v1962_v40 }
 0x10c   :  { %1639 = vmatmul.mubr.bf16.vlgmr.msra.gmra.mrb[12].mxu0 %v2461_v6  ;;  %1672 = vmatpush1.bf16.msra.mxu1 %v2135_v42 }
 0x10d   :  { %1693 = vmatpush1.bf16.msra.mxu0 %v1961_v43  ;;  %2146 = vmatprep.mubr.msk.bf16.mxu0 %vm194_vm0, %v2217_v48 }
 0x10e   :  { %1694 = vmatprep.subr.bf16.mxu0 %v1978_v44 }
 0x10f   :  { %1682 = vmatmul.mubr.bf16.vlgmr.msra.gmra.mrb[12].mxu1 %v2461_v6  ;;  %v350_v6 = vld [vmem:[#allocation6 + $0x378] sm:$0xff] }
 0x110   :  { %v2058_v1 = vcombine.high %v342_v62, %v350_v6  ;;  %v2057_v4 = vcombine.low %v342_v62, %v350_v6  ;;  %1827 = vmatprep.mubr.bf16.mxu1 %v2216_v46 }
 0x111   :  { %1695 = vmatpush1.bf16.msra.mxu0 %v1977_v47 }
 0x112   :  { %1696 = vmatprep.subr.bf16.mxu0 %v1994_v49 }
 0x115   :  { %1697 = vmatpush1.bf16.msra.mxu0 %v1993_v52 }
 0x116   :  { %1698 = vmatprep.subr.bf16.mxu0 %v2010_v53 }
 0x119   :  { %1699 = vmatpush1.bf16.msra.mxu0 %v2009_v56 }
 0x11a   :  { %1700 = vmatprep.subr.bf16.mxu0 %v2026_v57 }
 0x11d   :  { %1701 = vmatpush1.bf16.msra.mxu0 %v2025_v60 }
 0x11e   :  { %1702 = vmatprep.subr.bf16.mxu0 %v2042_v61 }
 0x121   :  { %1703 = vmatpush1.bf16.msra.mxu0 %v2041_v63 }
 0x122   :  { %1704 = vmatprep.subr.bf16.mxu0 %v2058_v1 }
 0x125   :  { %1705 = vmatpush1.bf16.msra.mxu0 %v2057_v4 }
 0x126   :  { %1706 = vmatprep.subr.bf16.mxu0 %v2074_v5 }
 0x129   :  { %1707 = vmatpush1.bf16.msra.mxu0 %v2073_v9 }
 0x12a   :  { %1708 = vmatprep.subr.bf16.mxu0 %v2090_v10 }
 0x12d   :  { %1709 = vmatpush1.bf16.msra.mxu0 %v2089_v13 }
 0x12e   :  { %1710 = vmatprep.subr.bf16.mxu0 %v2106_v0  ;;  %v2214_v0 = vld [vmem:[#allocation9] ss:$8 sps:$4 sm:$0xff]  }
 0x131   :  { %1711 = vmatpush1.bf16.msra.mxu0 %v2105_v16  ;;  %v1931_v16 = vld [vmem:[%s2511_s3] ss:$0 sm:$0xff]  ;;  %s2350_s3 = smov [#allocation11]  }
 0x132   :  { %1712 = vmatprep.subr.bf16.mxu0 %v2122_v17  ;;  %s1920_s25 = sshll.u32 %s2350_s3, 4  ;;  %s1921_s25 = int_to_ptr.vmem [resolvable:$true] %s1920_s25 }
 0x133   :  { %s2307_s26 = scalar_lea.vmem %s1921_s25, 128  ;;  %p2312_p5 = scmp.lt.s32.totalorder %s1921_s25, %s1921_s25 }
 0x134   :  { %p2308_p4 = scmp.ne.s32.totalorder %s1921_s25, %s2307_s26  ;;  %p2313_p6 = scmp.lt.s32.totalorder %s2307_s26, %s2307_s26 }
 0x135   :  { %1713 = vmatpush1.bf16.msra.mxu0 %v2121_v20 }
 0x136   :  { %1714 = vmatprep.subr.bf16.mxu0 %v2138_v21  ;;  %p2314_p7 = por %p2313_p6, %p2312_p5 }
 0x138   :  { %p2315_p8 = pnand %p2314_p7, %p2308_p4 }
 0x139   :  { %1715 = vmatpush1.bf16.msra.mxu0 %v2137_v22 }
 0x13c   :  { %1725 = vmatmul.mubr.bf16.vlgmr.msra.gmra.mrb[16].mxu0 %v2218_v23 }
 0x14e   :  { %v2484_v24 = vpop.f32.mrb[0].mxu0 }
 0x14f   :  { %v234_v25 = vpop.f32.mrb[1].mxu0  ;;  %v233_v19 = vadd.f32 %v1931_v16, %v2484_v24 }
 0x150   :  { %v2486_v26 = vpop.f32.mrb[2].mxu0 }
 0x151   :  { %v237_v27 = vpop.f32.mrb[3].mxu0  ;;  %v236_v23 = vadd.f32 %v1931_v16, %v2486_v26 }
 0x152   :  { %v1425_v28 = vpop.f32.mrb[0].mxu1 }
 0x153   :  { %v1427_v29 = vpop.f32.mrb[1].mxu1 }
 0x154   :  { %v1429_v30 = vpop.f32.mrb[2].mxu1 }
 0x155   :  { %v1735_v31 = vpack.c.bf16 %v1429_v30, %v1425_v28  ;;  %v1431_v33 = vpop.f32.mrb[3].mxu1  ;;  %v1838_v30 = vld [vmem:[%s2513_s5] sm:$0xff] }
 0x156   :  { %v1737_v34 = vpack.c.bf16 %v1431_v33, %v1427_v29 }
 0x17f   :  { %v1468_v35 = vpop.f32.mrb[4].mxu0 }
 0x180   :  { %v1470_v36 = vpop.f32.mrb[5].mxu0 }
 0x181   :  { %v1472_v37 = vpop.f32.mrb[6].mxu0 }
 0x182   :  { %v1739_v38 = vpack.c.bf16 %v1472_v37, %v1468_v35  ;;  %v1474_v39 = vpop.f32.mrb[7].mxu0  ;;  %v1511_v40 = vpop.f32.mrb[4].mxu1 }
 0x183   :  { %v1741_v32 = vpack.c.bf16 %v1474_v39, %v1470_v36  ;;  %v1513_v41 = vpop.f32.mrb[5].mxu1 }
 0x184   :  { %v1515_v42 = vpop.f32.mrb[6].mxu1 }
 0x185   :  { %v1743_v43 = vpack.c.bf16 %v1515_v42, %v1511_v40  ;;  %v1517_v44 = vpop.f32.mrb[7].mxu1 }
 0x186   :  { %v1745_v45 = vpack.c.bf16 %v1517_v44, %v1513_v41 }
 0x1af   :  { %v1554_v47 = vpop.f32.mrb[8].mxu0 }
 0x1b0   :  { %v1556_v48 = vpop.f32.mrb[9].mxu0 }
 0x1b1   :  { %v1558_v49 = vpop.f32.mrb[10].mxu0 }
 0x1b2   :  { %v1597_v50 = vpop.f32.mrb[8].mxu1  ;;  %v1747_v51 = vpack.c.bf16 %v1558_v49, %v1554_v47  ;;  %v1560_v52 = vpop.f32.mrb[11].mxu0 }
 0x1b3   :  { %v1599_v53 = vpop.f32.mrb[9].mxu1  ;;  %v1749_v54 = vpack.c.bf16 %v1560_v52, %v1556_v48 }
 0x1b4   :  { %v1601_v55 = vpop.f32.mrb[10].mxu1 }
 0x1b5   :  { %v1751_v56 = vpack.c.bf16 %v1601_v55, %v1597_v50  ;;  %v1603_v57 = vpop.f32.mrb[11].mxu1 }
 0x1b6   :  { %v1753_v58 = vpack.c.bf16 %v1603_v57, %v1599_v53 }
 0x1b7   :  { %2150 = vmatprep.subr.bf16.mxu1 %v1751_v56 }
 0x1b8   :  { %2151 = vmatpush3.bf16.msra.mxu1 %v1735_v31 }
 0x1b9   :  { %2152 = vmatprep.subr.bf16.mxu1 %v1753_v58 }
 0x1bc   :  { %2153 = vmatpush3.bf16.msra.mxu1 %v1737_v34 }
 0x1df   :  { %v1640_v59 = vpop.f32.mrb[12].mxu0 }
 0x1e0   :  { %v1642_v60 = vpop.f32.mrb[13].mxu0 }
 0x1e1   :  { %v1644_v61 = vpop.f32.mrb[14].mxu0 }
 0x1e2   :  { %v1755_v62 = vpack.c.bf16 %v1644_v61, %v1640_v59  ;;  %v1646_v6 = vpop.f32.mrb[15].mxu0  ;;  %v1683_v63 = vpop.f32.mrb[12].mxu1 }
 0x1e3   :  { %v1757_v1 = vpack.c.bf16 %v1646_v6, %v1642_v60  ;;  %v1685_v2 = vpop.f32.mrb[13].mxu1 }
 0x1e4   :  { %2154 = vmatprep.subr.bf16.mxu1 %v1755_v62  ;;  %v1687_v3 = vpop.f32.mrb[14].mxu1 }
 0x1e5   :  { %2155 = vmatpush3.bf16.msra.mxu1 %v1739_v38  ;;  %v1759_v4 = vpack.c.bf16 %v1687_v3, %v1683_v63  ;;  %v1689_v5 = vpop.f32.mrb[15].mxu1 }
 0x1e6   :  { %2156 = vmatprep.subr.bf16.mxu1 %v1757_v1  ;;  %v1761_v7 = vpack.c.bf16 %v1689_v5, %v1685_v2 }
 0x1e9   :  { %2157 = vmatpush3.bf16.msra.mxu1 %v1741_v32 }
 0x1ea   :  { %2158 = vmatprep.subr.bf16.mxu1 %v1759_v4 }
 0x1ed   :  { %2159 = vmatpush3.bf16.msra.mxu1 %v1743_v43 }
 0x1ee   :  { %2160 = vmatprep.subr.bf16.mxu1 %v1761_v7 }
 0x1f1   :  { %2161 = vmatpush3.bf16.msra.mxu1 %v1745_v45 }
 0x20f   :  { %v1726_v8 = vpop.f32.mrb[16].mxu0 }
 0x210   :  { %v1728_v9 = vpop.f32.mrb[17].mxu0 }
 0x211   :  { %v1730_v10 = vpop.f32.mrb[18].mxu0 }
 0x212   :  { %v1763_v11 = vpack.c.bf16 %v1730_v10, %v1726_v8  ;;  %v1732_v12 = vpop.f32.mrb[19].mxu0 }
 0x213   :  { %v1765_v13 = vpack.c.bf16 %v1732_v12, %v1728_v9 }
 0x214   :  { %2162 = vmatprep.subr.bf16.mxu1 %v1763_v11 }
 0x215   :  { %2163 = vmatpush3.bf16.msra.mxu1 %v1747_v51 }
 0x216   :  { %2164 = vmatprep.subr.bf16.mxu1 %v1765_v13 }
 0x219   :  { %2165 = vmatpush3.bf16.msra.mxu1 %v1749_v54 }
 0x21a   :  { %2182 = vmatprep.subr.bf16.mxu1 %v2347_v14 }
 0x21c   :  { %1828 = vmatmul.mubr.bf16.vlgmr.msra.gmra.mrb[16].mxu1 %v2214_v0 }
 0x21d   :  { %2179 = vmatprep.mubr.msk.f32.mxu1 %vm2348_vm1, %v2349_v15 }
 0x2ef   :  { %v2166_v17 = vpop.f32.mrb[16].mxu1 }
 0x2f0   :  { %v2167_v18 = vpop.f32.mrb[17].mxu1 }
 0x2f1   :  { %v2168_v20 = vadd.f32 %v2167_v18, %v2166_v17  ;;  %v2169_v21 = vpop.f32.mrb[18].mxu1 }
 0x2f2   :  { %v2170_v22 = vpop.f32.mrb[19].mxu1 }
 0x2f3   :  { %v1836_v25 = vadd.f32 %v2168_v20, %v233_v19  ;;  %v2171_v27 = vadd.f32 %v2170_v22, %v2169_v21 }
 0x2f5   :  { %v1837_v28 = vadd.f32 %v2171_v27, %v236_v23 }
 0x2f7   :  { %v2183_v29 = vpack.c.bf16 %v1837_v28, %v1836_v25 }
 0x2f9   :  { %2184 = vmatpush3.bf16.msra.mxu1 %v2183_v29 }
 0x2fc   :  { %2180 = vmatmul.mubr.msk.f32.vlgmr.msra.gmra.mrb[20].mxu1 %vm1839_vm2, %v1838_v30 }
 0x3cf   :  { %v1909_v24 = vpop.f32.mrb[20].mxu1 }
 0x3d0   :  { %1913 = vst [vmem:[#allocation11] sm:$0xff] %v1909_v24  ;;  %v2181_v31 = vpop.f32.mrb[21].mxu1 }
 0x3d1   :  { %2318 = shalt.err (!%p2315_p8)
}
 0x3d2   :  { %s2319_s29 = scalar_lea.hbm %s2514_s6, 128 }
 0x3d3   :  { %p2320_p9 = scmp.ne.s32.totalorder %s2514_s6, %s2319_s29  ;;  %p2323_p10 = scmp.lt.u32.totalorder %s2319_s29, %s2514_s6 }
 0x3d5   :  { %p2325_p11 = pnand %p2323_p10, %p2320_p9 }
 0x3d7   :  { %2328 = shalt.err (!%p2325_p11)
}
 0x3d8   :  { %1923 = dma.vmem_to_hbm [thread:$0]  %s1921_s25, 128, %s2514_s6, [#allocation5]  }
 0x3d9   :  { %2335 = dma.done.wait [#allocation5], 128  }
 0x3da   :  { %2336 = vsyncadd [#allocation5], 4294967168 }
 0x3db   :  { %1927 = vsyncpa [#allocation4], 1 }
 0x3dc   :  { %1928 = vsyncpa [#allocation7], 1 }
 0x3dd   :  { %1929 = vsyncpa [#allocation10], 1 }
 0x3de   :  { %1930 = vsyncpa [#allocation5], 1 }

</bundles_post_ra>
